<compile_context>
chip_gen: v7x
topology: tpu7x:2x2x1
jax: 0.10.0
libtpu: 0.0.40
codegen_flags: <defaults>
</compile_context>

<pallas_src>
import jax
import jax.numpy as jnp
from jax.experimental import pallas as pl
from jax.experimental.pallas import tpu as pltpu


def _mlp_kernel(x_ref, w1_ref, b1_ref, w2_ref, b2_ref, w3_ref, b3_ref, o_ref):
    # Whole MLP fused per batch tile: bf16 weights (~1.34 MB) + f32 biases +
    # one activation tile fit comfortably in VMEM on all generations.
    x = x_ref[...]                                              # bf16 already
    h1 = jnp.dot(x, w1_ref[...], preferred_element_type=jnp.float32) + b1_ref[...]
    h1 = jnp.maximum(h1, 0.0)                                   # ReLU (f32 VPU)
    h2 = jnp.dot(h1.astype(jnp.bfloat16), w2_ref[...],
                 preferred_element_type=jnp.float32) + b2_ref[...]
    h2 = jnp.maximum(h2, 0.0)                                   # ReLU (f32 VPU)
    o_ref[...] = (jnp.dot(h2.astype(jnp.bfloat16), w3_ref[...],
                          preferred_element_type=jnp.float32)
                  + b3_ref[...]).astype(o_ref.dtype)


def _round_up(x, m):
    return -(-x // m) * m


def prepare_params(params):
    """One-time weight prep: zero-pad the ragged hidden dim (509 -> 512) for
    (8,128) lane/sublane alignment and cast weights to bf16 for half the
    HBM->VMEM DMA. Extra w1/b1 columns are zero -> padded h1 columns are
    ReLU(0)=0 -> the extra w2/w3 rows contribute nothing, so results are
    identical. Biases stay f32 (epilogue runs in f32)."""
    w1, b1, w2, b2, w3, b3 = params           # f32, weights stored (in, out)
    mid = w1.shape[1]
    mid_pad = _round_up(mid, 128)
    pm = mid_pad - mid
    w1p = jnp.pad(w1, ((0, 0), (0, pm))).astype(jnp.bfloat16)
    b1p = jnp.pad(b1, ((0, 0), (0, pm)))
    w2p = jnp.pad(w2, ((0, pm), (0, pm))).astype(jnp.bfloat16)
    b2p = jnp.pad(b2, ((0, 0), (0, pm)))
    w3p = jnp.pad(w3, ((0, pm), (0, 0))).astype(jnp.bfloat16)
    b3p = b3
    return w1p, b1p, w2p, b2p, w3p, b3p


def neural_network_forward(x_nchw, prepared_params):
    """Forward pass matching NeuralNetwork.forward.

    x_nchw: (N, C, H, W) f32. prepared_params: output of prepare_params."""
    w1p, b1p, w2p, b2p, w3p, b3p = prepared_params
    n = x_nchw.shape[0]
    in_features = w1p.shape[0]
    mid_pad = w1p.shape[1]
    out_features = w3p.shape[1]

    # nn.Flatten(): (N, C*H*W); cast to bf16 once (MXU consumes bf16 anyway).
    x2d = x_nchw.reshape(n, -1).astype(jnp.bfloat16)

    # Batch tiling: a single resident-weight grid over row tiles. For small N
    # the grid has one step (single-shot); for large N activation tiles are
    # double-buffered behind the MXU while weights stay in VMEM.
    if n <= 256:
        n_pad = max(8, _round_up(n, 8))
        tb = n_pad
    else:
        tb = 256
        n_pad = _round_up(n, tb)
    if n_pad != n:
        x2d = jnp.pad(x2d, ((0, n_pad - n), (0, 0)))
    n_blocks = n_pad // tb

    resident = lambda a: pl.BlockSpec(a.shape, lambda i: (0,) * a.ndim)

    flops = 2 * n_pad * (in_features * mid_pad + mid_pad * mid_pad
                         + mid_pad * out_features)
    bytes_accessed = (
        2 * (w1p.size + w2p.size + w3p.size)        # bf16 weights
        + 4 * (b1p.size + b2p.size + b3p.size)      # f32 biases
        + 2 * n_pad * in_features                   # bf16 activations in
        + 4 * n_pad * out_features)                 # f32 output

    out = pl.pallas_call(
        _mlp_kernel,
        out_shape=jax.ShapeDtypeStruct((n_pad, out_features), jnp.float32),
        grid_spec=pltpu.PrefetchScalarGridSpec(
            num_scalar_prefetch=0,
            grid=(n_blocks,),
            in_specs=[pl.BlockSpec((tb, in_features), lambda i: (i, 0)),
                      resident(w1p), resident(b1p),
                      resident(w2p), resident(b2p),
                      resident(w3p), resident(b3p)],
            out_specs=pl.BlockSpec((tb, out_features), lambda i: (i, 0)),
        ),
        compiler_params=pltpu.CompilerParams(
            dimension_semantics=("parallel",),
            vmem_limit_bytes=8 << 20),
        cost_estimate=pl.CostEstimate(flops=flops,
                                      bytes_accessed=bytes_accessed,
                                      transcendentals=0),
    )(x2d, w1p, b1p, w2p, b2p, w3p, b3p)
    return out[:n]


def init_params(key, in_features, mid_features, out_features):
    """Deterministic synthetic init (shapes mirror the torch module).
    Weights are stored as (in, out), i.e. torch weight transposed."""
    ks = jax.random.split(key, 6)
    scale = lambda fan_in: 1.0 / jnp.sqrt(jnp.float32(fan_in))
    w1 = jax.random.uniform(ks[0], (in_features, mid_features), jnp.float32,
                            -scale(in_features), scale(in_features))
    b1 = jax.random.uniform(ks[1], (1, mid_features), jnp.float32,
                            -scale(in_features), scale(in_features))
    w2 = jax.random.uniform(ks[2], (mid_features, mid_features), jnp.float32,
                            -scale(mid_features), scale(mid_features))
    b2 = jax.random.uniform(ks[3], (1, mid_features), jnp.float32,
                            -scale(mid_features), scale(mid_features))
    w3 = jax.random.uniform(ks[4], (mid_features, out_features), jnp.float32,
                            -scale(mid_features), scale(mid_features))
    b3 = jax.random.uniform(ks[5], (1, out_features), jnp.float32,
                            -scale(mid_features), scale(mid_features))
    return w1, b1, w2, b2, w3, b3


if __name__ == "__main__":
    # Module defaults: channel=1, in_features=28*28=784, out_features=10.
    channel, height, width = 1, 28, 28
    in_features = channel * height * width          # 784
    out_features = 10
    # mid_features = int(in_features * 0.65); the torch __init__ only shrinks
    # it if GPU VRAM is tiny — that host-side device query has no kernel
    # analogue, so we take the normal branch.
    # TODO(synk): torch.cuda.get_device_properties VRAM check is host config, not compute.
    mid_features = int(in_features * 0.65)          # 509

    key = jax.random.PRNGKey(0)
    k_params, k_x = jax.random.split(key)
    params = init_params(k_params, in_features, mid_features, out_features)
    prepared = prepare_params(params)               # one-time weight prep
    prepared = jax.block_until_ready(prepared)

    batch = 2
    x = jax.random.normal(k_x, (batch, channel, height, width), jnp.float32)

    out = neural_network_forward(x, prepared)
    jax.block_until_ready(out)
    assert out.shape == (batch, out_features) and out.dtype == jnp.float32

    w1, b1, w2, b2, w3, b3 = params
    x2d = x.reshape(batch, -1)

    # Reference 1: same bf16-weight / f32-accumulate math in plain JAX (tight).
    bf = jnp.bfloat16
    r = jnp.maximum(jnp.dot(x2d.astype(bf), w1.astype(bf),
                            preferred_element_type=jnp.float32) + b1, 0.0)
    r = jnp.maximum(jnp.dot(r.astype(bf), w2.astype(bf),
                            preferred_element_type=jnp.float32) + b2, 0.0)
    ref_bf16 = jnp.dot(r.astype(bf), w3.astype(bf),
                       preferred_element_type=jnp.float32) + b3
    assert jnp.allclose(out, ref_bf16, atol=2e-3, rtol=2e-3)

    # Reference 2: full-f32 torch-equivalent math (loose; bounds bf16 error).
    ref_f32 = jnp.maximum(x2d @ w1 + b1, 0.0)
    ref_f32 = jnp.maximum(ref_f32 @ w2 + b2, 0.0)
    ref_f32 = ref_f32 @ w3 + b3
    assert jnp.allclose(out, ref_f32, atol=5e-2, rtol=5e-2)

    print("KERNEL_OK")
</pallas_src>

<mosaic_0001>
module attributes {stable_mosaic.version = 11 : i64} {
  func.func @_mlp_kernel(%arg0: i32, %arg1: memref<8x784xbf16, #tpu.memory_space<vmem>>, %arg2: memref<784x512xbf16, #tpu.memory_space<vmem>>, %arg3: memref<1x512xf32, #tpu.memory_space<vmem>>, %arg4: memref<512x512xbf16, #tpu.memory_space<vmem>>, %arg5: memref<1x512xf32, #tpu.memory_space<vmem>>, %arg6: memref<512x10xbf16, #tpu.memory_space<vmem>>, %arg7: memref<1x10xf32, #tpu.memory_space<vmem>>, %arg8: memref<8x10xf32, #tpu.memory_space<vmem>>) attributes {dimension_semantics = [#tpu.dimension_semantics<parallel>], iteration_bounds = array<i64: 1>, scalar_prefetch = 0 : i64, scratch_operands = 0 : i64, tpu.core_type = #tpu.core_type<tc>, window_params = [{transform_indices = @transform_0, window_bounds = array<i64: 8, 784>}, {pipeline_mode = #tpu.pipeline_mode<synchronous>, transform_indices = @transform_1, window_bounds = array<i64: 784, 512>}, {pipeline_mode = #tpu.pipeline_mode<synchronous>, transform_indices = @transform_2, window_bounds = array<i64: 1, 512>}, {pipeline_mode = #tpu.pipeline_mode<synchronous>, transform_indices = @transform_3, window_bounds = array<i64: 512, 512>}, {pipeline_mode = #tpu.pipeline_mode<synchronous>, transform_indices = @transform_4, window_bounds = array<i64: 1, 512>}, {pipeline_mode = #tpu.pipeline_mode<synchronous>, transform_indices = @transform_5, window_bounds = array<i64: 512, 10>}, {pipeline_mode = #tpu.pipeline_mode<synchronous>, transform_indices = @transform_6, window_bounds = array<i64: 1, 10>}, {transform_indices = @transform_7, window_bounds = array<i64: 8, 10>}]} {
    %c0 = arith.constant 0 : index
    %c0_0 = arith.constant 0 : index
    %0 = vector.load %arg1[%c0, %c0_0] : memref<8x784xbf16, #tpu.memory_space<vmem>>, vector<8x784xbf16>
    %c0_1 = arith.constant 0 : index
    %c0_2 = arith.constant 0 : index
    %1 = vector.load %arg2[%c0_1, %c0_2] : memref<784x512xbf16, #tpu.memory_space<vmem>>, vector<784x512xbf16>
    %cst = arith.constant dense<0.000000e+00> : vector<8x512xf32>
    %2 = tpu.matmul %0, %1, %cst {dimension_numbers = #tpu.dot_dimension_numbers<[1], [0], [0], [1], [0, 0, 1, 1], [], []>} : vector<8x784xbf16>, vector<784x512xbf16>, vector<8x512xf32> -> vector<8x512xf32>
    %c0_3 = arith.constant 0 : index
    %c0_4 = arith.constant 0 : index
    %3 = vector.load %arg3[%c0_3, %c0_4] : memref<1x512xf32, #tpu.memory_space<vmem>>, vector<1x512xf32>
    %4 = vector.broadcast %3 : vector<1x512xf32> to vector<8x512xf32>
    %5 = arith.addf %2, %4 : vector<8x512xf32>
    %cst_5 = arith.constant 0.000000e+00 : f32
    %6 = vector.broadcast %cst_5 : f32 to vector<8x512xf32>
    %7 = arith.maximumf %5, %6 : vector<8x512xf32>
    %8 = arith.truncf %7 : vector<8x512xf32> to vector<8x512xbf16>
    %c0_6 = arith.constant 0 : index
    %c0_7 = arith.constant 0 : index
    %9 = vector.load %arg4[%c0_6, %c0_7] : memref<512x512xbf16, #tpu.memory_space<vmem>>, vector<512x512xbf16>
    %cst_8 = arith.constant dense<0.000000e+00> : vector<8x512xf32>
    %10 = tpu.matmul %8, %9, %cst_8 {dimension_numbers = #tpu.dot_dimension_numbers<[1], [0], [0], [1], [0, 0, 1, 1], [], []>} : vector<8x512xbf16>, vector<512x512xbf16>, vector<8x512xf32> -> vector<8x512xf32>
    %c0_9 = arith.constant 0 : index
    %c0_10 = arith.constant 0 : index
    %11 = vector.load %arg5[%c0_9, %c0_10] : memref<1x512xf32, #tpu.memory_space<vmem>>, vector<1x512xf32>
    %12 = vector.broadcast %11 : vector<1x512xf32> to vector<8x512xf32>
    %13 = arith.addf %10, %12 : vector<8x512xf32>
    %cst_11 = arith.constant 0.000000e+00 : f32
    %14 = vector.broadcast %cst_11 : f32 to vector<8x512xf32>
    %15 = arith.maximumf %13, %14 : vector<8x512xf32>
    %16 = arith.truncf %15 : vector<8x512xf32> to vector<8x512xbf16>
    %c0_12 = arith.constant 0 : index
    %c0_13 = arith.constant 0 : index
    %17 = vector.load %arg6[%c0_12, %c0_13] : memref<512x10xbf16, #tpu.memory_space<vmem>>, vector<512x10xbf16>
    %cst_14 = arith.constant dense<0.000000e+00> : vector<8x10xf32>
    %18 = tpu.matmul %16, %17, %cst_14 {dimension_numbers = #tpu.dot_dimension_numbers<[1], [0], [0], [1], [0, 0, 1, 1], [], []>} : vector<8x512xbf16>, vector<512x10xbf16>, vector<8x10xf32> -> vector<8x10xf32>
    %c0_15 = arith.constant 0 : index
    %c0_16 = arith.constant 0 : index
    %19 = vector.load %arg7[%c0_15, %c0_16] : memref<1x10xf32, #tpu.memory_space<vmem>>, vector<1x10xf32>
    %20 = vector.broadcast %19 : vector<1x10xf32> to vector<8x10xf32>
    %21 = arith.addf %18, %20 : vector<8x10xf32>
    %c0_17 = arith.constant 0 : index
    %c0_18 = arith.constant 0 : index
    %22 = vector.load %arg8[%c0_17, %c0_18] : memref<8x10xf32, #tpu.memory_space<vmem>>, vector<8x10xf32>
    tpu.vector_store %arg8[%c0_17, %c0_18], %21 {strides = array<i32>} : memref<8x10xf32, #tpu.memory_space<vmem>>, vector<8x10xf32>,
    return
  }
  func.func @transform_0(%arg0: i32) -> (i32, i32) {
    %c0_i32 = arith.constant 0 : i32
    %c0_i32_0 = arith.constant 0 : i32
    return %arg0, %c0_i32 : i32, i32
  }
  func.func @transform_1(%arg0: i32) -> (i32, i32) {
    %c0_i32 = arith.constant 0 : i32
    %c0_i32_0 = arith.constant 0 : i32
    %c0_i32_1 = arith.constant 0 : i32
    return %c0_i32, %c0_i32_0 : i32, i32
  }
  func.func @transform_2(%arg0: i32) -> (i32, i32) {
    %c0_i32 = arith.constant 0 : i32
    %c0_i32_0 = arith.constant 0 : i32
    %c0_i32_1 = arith.constant 0 : i32
    return %c0_i32, %c0_i32_0 : i32, i32
  }
  func.func @transform_3(%arg0: i32) -> (i32, i32) {
    %c0_i32 = arith.constant 0 : i32
    %c0_i32_0 = arith.constant 0 : i32
    %c0_i32_1 = arith.constant 0 : i32
    return %c0_i32, %c0_i32_0 : i32, i32
  }
  func.func @transform_4(%arg0: i32) -> (i32, i32) {
    %c0_i32 = arith.constant 0 : i32
    %c0_i32_0 = arith.constant 0 : i32
    %c0_i32_1 = arith.constant 0 : i32
    return %c0_i32, %c0_i32_0 : i32, i32
  }
  func.func @transform_5(%arg0: i32) -> (i32, i32) {
    %c0_i32 = arith.constant 0 : i32
    %c0_i32_0 = arith.constant 0 : i32
    %c0_i32_1 = arith.constant 0 : i32
    return %c0_i32, %c0_i32_0 : i32, i32
  }
  func.func @transform_6(%arg0: i32) -> (i32, i32) {
    %c0_i32 = arith.constant 0 : i32
    %c0_i32_0 = arith.constant 0 : i32
    %c0_i32_1 = arith.constant 0 : i32
    return %c0_i32, %c0_i32_0 : i32, i32
  }
  func.func @transform_7(%arg0: i32) -> (i32, i32) {
    %c0_i32 = arith.constant 0 : i32
    %c0_i32_0 = arith.constant 0 : i32
    return %arg0, %c0_i32 : i32, i32
  }
}

</mosaic_0001>

<bundles_post_ra>
// kernel: tpu_custom_call.1
= control target key start
LH: loop header
LB: loop body
LE: loop exit
PB: predicated region body
PF: predicated region fallthrough
CT: control target
= control target key end

     0   :  { %12 = vsyncpa [#allocation3], 0  ;;  %s4240_s0 = inlined_call_operand.vmem [shape: bf16[8,784], index: 0, kind: input, shape index: {}]   ;;  %s4241_s1 = inlined_call_operand.hbm [shape: bf16[784,512], index: 1, kind: input, shape index: {}]   ;;  %s4242_s2 = inlined_call_operand.vmem [shape: f32[1,512], index: 2, kind: input, shape index: {}]   ;;  %s4243_s3 = inlined_call_operand.hbm [shape: bf16[512,512], index: 3, kind: input, shape index: {}]   ;;  %s4244_s4 = inlined_call_operand.vmem [shape: f32[1,512], index: 4, kind: input, shape index: {}]   ;;  %s4245_s5 = inlined_call_operand.vmem [shape: bf16[512,10], index: 5, kind: input, shape index: {}]   ;;  %s4246_s6 = inlined_call_operand.vmem [shape: f32[1,10], index: 6, kind: input, shape index: {}]   ;;  %s4247_s7 = inlined_call_operand.hbm [shape: f32[8,10], index: 7, kind: output, shape index: {}]  }
   0x1   :  { %13 = vsyncpa [#allocation6], 0 }
   0x2   :  { %14 = vsyncpa [#allocation4], 0  ;;  %s3998_s24 = smov [#allocation2]   ;;  %s3926_s28 = scalar_lea.hbm %s4241_s1, 25088 }
   0x3   :  { %s22_s25 = sshll.u32 %s3998_s24, 4  ;;  %p3927_p0 = scmp.ne.s32.totalorder %s4241_s1, %s3926_s28  ;;  %s23_s25 = int_to_ptr.vmem [resolvable:$true] %s22_s25 }
   0x4   :  { %p3930_p1 = scmp.lt.u32.totalorder %s3926_s28, %s4241_s1 }
   0x6   :  { %p3932_p2 = pnand %p3930_p1, %p3927_p0 }
   0x8   :  { %3935 = shalt.err (!%p3932_p2)
}
   0x9   :  { %s3936_s10 = scalar_lea.vmem %s23_s25, 25088  ;;  %p3941_p4 = scmp.lt.s32.totalorder %s23_s25, %s23_s25 }
   0xa   :  { %p3937_p3 = scmp.ne.s32.totalorder %s23_s25, %s3936_s10  ;;  %p3942_p5 = scmp.lt.s32.totalorder %s3936_s10, %s3936_s10 }
   0xc   :  { %p3943_p6 = por %p3942_p5, %p3941_p4 }
   0xe   :  { %p3944_p7 = pnand %p3943_p6, %p3937_p3 }
  0x10   :  { %3947 = shalt.err (!%p3944_p7)
}
  0x11   :  { %s3999_s11 = smov 256   ;;  %s4000_s12 = smov 16  }
  0x12   :  { %28 = dma.hbm_to_vmem [thread:$0]  %s4241_s1, 25088, %s23_s25, [#allocation3], %s3999_s11, %s3999_s11, %s4000_s12  }
  0x13   :  { %s4001_s15 = smov [#allocation5]   ;;  %s3948_s19 = scalar_lea.hbm %s4243_s3, 16384 }
  0x14   :  { %s36_s16 = sshll.u32 %s4001_s15, 4  ;;  %p3949_p8 = scmp.ne.s32.totalorder %s4243_s3, %s3948_s19  ;;  %s37_s16 = int_to_ptr.vmem [resolvable:$true] %s36_s16 }
  0x15   :  { %p3952_p9 = scmp.lt.u32.totalorder %s3948_s19, %s4243_s3 }
  0x17   :  { %p3954_p10 = pnand %p3952_p9, %p3949_p8 }
  0x19   :  { %3957 = shalt.err (!%p3954_p10)
}
  0x1a   :  { %s3958_s24 = scalar_lea.vmem %s37_s16, 16384  ;;  %p3963_p12 = scmp.lt.s32.totalorder %s37_s16, %s37_s16 }
  0x1b   :  { %p3959_p11 = scmp.ne.s32.totalorder %s37_s16, %s3958_s24  ;;  %p3964_p13 = scmp.lt.s32.totalorder %s3958_s24, %s3958_s24 }
  0x1d   :  { %p3965_p0 = por %p3964_p13, %p3963_p12 }
  0x1f   :  { %p3966_p1 = pnand %p3965_p0, %p3959_p11 }
  0x21   :  { %3969 = shalt.err (!%p3966_p1)
}
  0x22   :  { %42 = dma.hbm_to_vmem [thread:$0]  %s4243_s3, 16384, %s37_s16, [#allocation6], %s3999_s11, %s3999_s11, %s4000_s12  }
  0x23   :  { %3992 = dma.done.wait [#allocation3], 25088  }
  0x24   :  { %3993 = vsyncadd [#allocation3], 4294942208 }
  0x25   :  { %3994 = dma.done.wait [#allocation6], 16384  }
  0x26   :  { %3995 = vsyncadd [#allocation6], 4294950912  ;;  %v3401_v0 = vld [vmem:[#allocation2 + $0x4] ss:$16 sps:$4 sm:$0xff]   ;;  %v3403_v1 = vld [vmem:[#allocation2 + $0xc] ss:$16 sps:$4 sm:$0xff]  }
  0x27   :  { %1286 = vmatprep.subr.bf16.mxu0 %v3401_v0  ;;  %v3405_v2 = vld [vmem:[#allocation2] ss:$16 sps:$4 sm:$0xff]   ;;  %v3406_v3 = vld [vmem:[#allocation2 + $0x8] ss:$16 sps:$4 sm:$0xff]   ;;  %1450 = vmatprep.subr.bf16.mxu1 %v3403_v1  ;;  %v3407_v4 = vld [vmem:[#allocation2 + $0x24] ss:$16 sps:$4 sm:$0xff]  }
  0x28   :  { %1287 = vmatpush1.bf16.msra.mxu0 %v3405_v2  ;;  %1451 = vmatpush1.bf16.msra.mxu1 %v3406_v3  ;;  %v3409_v5 = vld [vmem:[#allocation2 + $0x2c] ss:$16 sps:$4 sm:$0xff]   ;;  %v3411_v6 = vld [vmem:[#allocation2 + $0x20] ss:$16 sps:$4 sm:$0xff]   ;;  %v3412_v7 = vld [vmem:[#allocation2 + $0x28] ss:$16 sps:$4 sm:$0xff]  }
  0x29   :  { %1288 = vmatprep.subr.bf16.mxu0 %v3407_v4  ;;  %1452 = vmatprep.subr.bf16.mxu1 %v3409_v5  ;;  %v3413_v8 = vld [vmem:[#allocation2 + $0x44] ss:$16 sps:$4 sm:$0xff]   ;;  %v3415_v9 = vld [vmem:[#allocation2 + $0x4c] ss:$16 sps:$4 sm:$0xff]   ;;  %v3417_v10 = vld [vmem:[#allocation2 + $0x40] ss:$16 sps:$4 sm:$0xff]  }
  0x2a   :  { %v3418_v11 = vld [vmem:[#allocation2 + $0x48] ss:$16 sps:$4 sm:$0xff]   ;;  %v3419_v12 = vld [vmem:[#allocation2 + $0x64] ss:$16 sps:$4 sm:$0xff]   ;;  %v3421_v13 = vld [vmem:[#allocation2 + $0x6c] ss:$16 sps:$4 sm:$0xff]  }
  0x2b   :  { %v3423_v14 = vld [vmem:[#allocation2 + $0x60] ss:$16 sps:$4 sm:$0xff]   ;;  %v3424_v15 = vld [vmem:[#allocation2 + $0x68] ss:$16 sps:$4 sm:$0xff]   ;;  %v3425_v16 = vld [vmem:[#allocation2 + $0x84] ss:$16 sps:$4 sm:$0xff]  }
  0x2c   :  { %1289 = vmatpush1.bf16.msra.mxu0 %v3411_v6  ;;  %1453 = vmatpush1.bf16.msra.mxu1 %v3412_v7  ;;  %v3427_v17 = vld [vmem:[#allocation2 + $0x8c] ss:$16 sps:$4 sm:$0xff]   ;;  %v3429_v18 = vld [vmem:[#allocation2 + $0x80] ss:$16 sps:$4 sm:$0xff]   ;;  %v3430_v19 = vld [vmem:[#allocation2 + $0x88] ss:$16 sps:$4 sm:$0xff]  }
  0x2d   :  { %1290 = vmatprep.subr.bf16.mxu0 %v3413_v8  ;;  %1454 = vmatprep.subr.bf16.mxu1 %v3415_v9  ;;  %v3431_v20 = vld [vmem:[#allocation2 + $0xa4] ss:$16 sps:$4 sm:$0xff]   ;;  %v3433_v21 = vld [vmem:[#allocation2 + $0xac] ss:$16 sps:$4 sm:$0xff]   ;;  %v3435_v22 = vld [vmem:[#allocation2 + $0xa0] ss:$16 sps:$4 sm:$0xff]  }
  0x2e   :  { %v3436_v23 = vld [vmem:[#allocation2 + $0xa8] ss:$16 sps:$4 sm:$0xff]   ;;  %v3437_v24 = vld [vmem:[#allocation2 + $0xc4] ss:$16 sps:$4 sm:$0xff]   ;;  %v3439_v25 = vld [vmem:[#allocation2 + $0xcc] ss:$16 sps:$4 sm:$0xff]  }
  0x2f   :  { %v3441_v26 = vld [vmem:[#allocation2 + $0xc0] ss:$16 sps:$4 sm:$0xff]   ;;  %v3442_v27 = vld [vmem:[#allocation2 + $0xc8] ss:$16 sps:$4 sm:$0xff]   ;;  %v3443_v28 = vld [vmem:[#allocation2 + $0xe4] ss:$16 sps:$4 sm:$0xff]  }
  0x30   :  { %1291 = vmatpush1.bf16.msra.mxu0 %v3417_v10  ;;  %1455 = vmatpush1.bf16.msra.mxu1 %v3418_v11  ;;  %v3445_v29 = vld [vmem:[#allocation2 + $0xec] ss:$16 sps:$4 sm:$0xff]   ;;  %v3447_v30 = vld [vmem:[#allocation2 + $0xe0] ss:$16 sps:$4 sm:$0xff]   ;;  %v3448_v31 = vld [vmem:[#allocation2 + $0xe8] ss:$16 sps:$4 sm:$0xff]  }
  0x31   :  { %1292 = vmatprep.subr.bf16.mxu0 %v3419_v12  ;;  %1456 = vmatprep.subr.bf16.mxu1 %v3421_v13  ;;  %v3449_v32 = vld [vmem:[#allocation2 + $0x104] ss:$16 sps:$4 sm:$0xff]   ;;  %v3451_v33 = vld [vmem:[#allocation2 + $0x10c] ss:$16 sps:$4 sm:$0xff]   ;;  %v3453_v34 = vld [vmem:[#allocation2 + $0x100] ss:$16 sps:$4 sm:$0xff]  }
  0x32   :  { %v3454_v35 = vld [vmem:[#allocation2 + $0x108] ss:$16 sps:$4 sm:$0xff]   ;;  %v3455_v36 = vld [vmem:[#allocation2 + $0x124] ss:$16 sps:$4 sm:$0xff]   ;;  %v3457_v37 = vld [vmem:[#allocation2 + $0x12c] ss:$16 sps:$4 sm:$0xff]  }
  0x33   :  { %v3459_v38 = vld [vmem:[#allocation2 + $0x120] ss:$16 sps:$4 sm:$0xff]   ;;  %v3460_v39 = vld [vmem:[#allocation2 + $0x128] ss:$16 sps:$4 sm:$0xff]   ;;  %v3461_v40 = vld [vmem:[#allocation2 + $0x144] ss:$16 sps:$4 sm:$0xff]  }
  0x34   :  { %1293 = vmatpush1.bf16.msra.mxu0 %v3423_v14  ;;  %1457 = vmatpush1.bf16.msra.mxu1 %v3424_v15  ;;  %v3463_v41 = vld [vmem:[#allocation2 + $0x14c] ss:$16 sps:$4 sm:$0xff]   ;;  %v3465_v42 = vld [vmem:[#allocation2 + $0x140] ss:$16 sps:$4 sm:$0xff]   ;;  %v3466_v43 = vld [vmem:[#allocation2 + $0x148] ss:$16 sps:$4 sm:$0xff]  }
  0x35   :  { %1294 = vmatprep.subr.bf16.mxu0 %v3425_v16  ;;  %1458 = vmatprep.subr.bf16.mxu1 %v3427_v17  ;;  %v3467_v44 = vld [vmem:[#allocation2 + $0x164] ss:$16 sps:$4 sm:$0xff]   ;;  %v3469_v45 = vld [vmem:[#allocation2 + $0x16c] ss:$16 sps:$4 sm:$0xff]   ;;  %v3471_v47 = vld [vmem:[#allocation2 + $0x160] ss:$16 sps:$4 sm:$0xff]  }
  0x36   :  { %v56_v46 = vld [vmem:[%s4240_s0] sm:$0xff]  ;;  %v3472_v49 = vld [vmem:[#allocation2 + $0x168] ss:$16 sps:$4 sm:$0xff]   ;;  %v3475_v51 = vld [vmem:[#allocation2 + $0x18c] ss:$16 sps:$4 sm:$0xff]   ;;  %vm1282_vm0 = vcmask 130048  }
  0x37   :  { %v2946_v48 = vcombine.high %v56_v46, %v56_v46  ;;  %v3473_v50 = vld [vmem:[#allocation2 + $0x184] ss:$16 sps:$4 sm:$0xff]   ;;  %v3477_v52 = vld [vmem:[#allocation2 + $0x180] ss:$16 sps:$4 sm:$0xff]   ;;  %v3478_v53 = vld [vmem:[#allocation2 + $0x188] ss:$16 sps:$4 sm:$0xff]   ;;  %v2945_v4 = vcombine.low %v56_v46, %v56_v46 }
  0x38   :  { %1295 = vmatpush1.bf16.msra.mxu0 %v3429_v18  ;;  %1459 = vmatpush1.bf16.msra.mxu1 %v3430_v19  ;;  %v3479_v54 = vld [vmem:[#allocation2 + $0x1a4] ss:$16 sps:$4 sm:$0xff]   ;;  %v3481_v55 = vld [vmem:[#allocation2 + $0x1ac] ss:$16 sps:$4 sm:$0xff]   ;;  %v3483_v56 = vld [vmem:[#allocation2 + $0x1a0] ss:$16 sps:$4 sm:$0xff]  }
  0x39   :  { %1296 = vmatprep.subr.bf16.mxu0 %v3431_v20  ;;  %1460 = vmatprep.subr.bf16.mxu1 %v3433_v21  ;;  %v3484_v57 = vld [vmem:[#allocation2 + $0x1a8] ss:$16 sps:$4 sm:$0xff]   ;;  %v3485_v58 = vld [vmem:[#allocation2 + $0x1c4] ss:$16 sps:$4 sm:$0xff]   ;;  %v3487_v59 = vld [vmem:[#allocation2 + $0x1cc] ss:$16 sps:$4 sm:$0xff]  }
  0x3a   :  { %1318 = vmatprep.mubr.bf16.mxu0 %v2946_v48  ;;  %1482 = vmatprep.mubr.bf16.mxu1 %v2946_v48  ;;  %v3489_v60 = vld [vmem:[#allocation2 + $0x1c0] ss:$16 sps:$4 sm:$0xff]   ;;  %v3490_v61 = vld [vmem:[#allocation2 + $0x1c8] ss:$16 sps:$4 sm:$0xff]   ;;  %v3491_v62 = vld [vmem:[#allocation2 + $0x1e4] ss:$16 sps:$4 sm:$0xff]  }
  0x3b   :  { %v3493_v63 = vld [vmem:[#allocation2 + $0x1ec] ss:$16 sps:$4 sm:$0xff]   ;;  %v3495_v0 = vld [vmem:[#allocation2 + $0x1e0] ss:$16 sps:$4 sm:$0xff]   ;;  %v3496_v1 = vld [vmem:[#allocation2 + $0x1e8] ss:$16 sps:$4 sm:$0xff]  }
  0x3c   :  { %1297 = vmatpush1.bf16.msra.mxu0 %v3435_v22  ;;  %1461 = vmatpush1.bf16.msra.mxu1 %v3436_v23  ;;  %v3501_v2 = vld [vmem:[#allocation2 + $0x204] ss:$16 sps:$4 sm:$0xff]   ;;  %v3504_v3 = vld [vmem:[#allocation2 + $0x20c] ss:$16 sps:$4 sm:$0xff]   ;;  %v3499_v5 = vld [vmem:[#allocation2 + $0x200] ss:$16 sps:$4 sm:$0xff]  }
  0x3d   :  { %1298 = vmatprep.subr.bf16.mxu0 %v3437_v24  ;;  %1462 = vmatprep.subr.bf16.mxu1 %v3439_v25  ;;  %v3502_v6 = vld [vmem:[#allocation2 + $0x208] ss:$16 sps:$4 sm:$0xff]   ;;  %v3507_v7 = vld [vmem:[#allocation2 + $0x224] ss:$16 sps:$4 sm:$0xff]   ;;  %v3510_v8 = vld [vmem:[#allocation2 + $0x22c] ss:$16 sps:$4 sm:$0xff]  }
  0x3e   :  { %v3505_v9 = vld [vmem:[#allocation2 + $0x220] ss:$16 sps:$4 sm:$0xff]   ;;  %v3508_v10 = vld [vmem:[#allocation2 + $0x228] ss:$16 sps:$4 sm:$0xff]   ;;  %v3513_v11 = vld [vmem:[#allocation2 + $0x244] ss:$16 sps:$4 sm:$0xff]  }
  0x3f   :  { %v3516_v12 = vld [vmem:[#allocation2 + $0x24c] ss:$16 sps:$4 sm:$0xff]   ;;  %v3511_v13 = vld [vmem:[#allocation2 + $0x240] ss:$16 sps:$4 sm:$0xff]   ;;  %v3514_v14 = vld [vmem:[#allocation2 + $0x248] ss:$16 sps:$4 sm:$0xff]  }
  0x40   :  { %1299 = vmatpush1.bf16.msra.mxu0 %v3441_v26  ;;  %1463 = vmatpush1.bf16.msra.mxu1 %v3442_v27  ;;  %v3519_v15 = vld [vmem:[#allocation2 + $0x264] ss:$16 sps:$4 sm:$0xff]   ;;  %v3522_v16 = vld [vmem:[#allocation2 + $0x26c] ss:$16 sps:$4 sm:$0xff]   ;;  %v3517_v17 = vld [vmem:[#allocation2 + $0x260] ss:$16 sps:$4 sm:$0xff]  }
  0x41   :  { %1300 = vmatprep.subr.bf16.mxu0 %v3443_v28  ;;  %1464 = vmatprep.subr.bf16.mxu1 %v3445_v29  ;;  %v3520_v18 = vld [vmem:[#allocation2 + $0x268] ss:$16 sps:$4 sm:$0xff]   ;;  %v3525_v19 = vld [vmem:[#allocation2 + $0x284] ss:$16 sps:$4 sm:$0xff]   ;;  %v3528_v20 = vld [vmem:[#allocation2 + $0x28c] ss:$16 sps:$4 sm:$0xff]  }
  0x42   :  { %v3523_v21 = vld [vmem:[#allocation2 + $0x280] ss:$16 sps:$4 sm:$0xff]   ;;  %v3526_v22 = vld [vmem:[#allocation2 + $0x288] ss:$16 sps:$4 sm:$0xff]   ;;  %v3531_v23 = vld [vmem:[#allocation2 + $0x2a4] ss:$16 sps:$4 sm:$0xff]  }
  0x43   :  { %v3534_v24 = vld [vmem:[#allocation2 + $0x2ac] ss:$16 sps:$4 sm:$0xff]   ;;  %v3529_v25 = vld [vmem:[#allocation2 + $0x2a0] ss:$16 sps:$4 sm:$0xff]   ;;  %v3532_v26 = vld [vmem:[#allocation2 + $0x2a8] ss:$16 sps:$4 sm:$0xff]  }
  0x44   :  { %1301 = vmatpush1.bf16.msra.mxu0 %v3447_v30  ;;  %1465 = vmatpush1.bf16.msra.mxu1 %v3448_v31  ;;  %v3537_v27 = vld [vmem:[#allocation2 + $0x2c4] ss:$16 sps:$4 sm:$0xff]   ;;  %v3540_v28 = vld [vmem:[#allocation2 + $0x2cc] ss:$16 sps:$4 sm:$0xff]   ;;  %v3535_v31 = vld [vmem:[#allocation2 + $0x2c0] ss:$16 sps:$4 sm:$0xff]  }
  0x45   :  { %1302 = vmatprep.subr.bf16.mxu0 %v3449_v32  ;;  %1466 = vmatprep.subr.bf16.mxu1 %v3451_v33  ;;  %v4074_v29 = vld [vmem:[%s4240_s0 + $0x8] sm:$0xff]  ;;  %v3543_v33 = vld [vmem:[#allocation2 + $0x2e4] ss:$16 sps:$4 sm:$0xff]   ;;  %s4003_s22 = smov [#allocation7]   ;;  %vm2927_vm1 = vcmask 80896  }
  0x46   :  { %v2948_v30 = vcombine.high %v4074_v29, %v4074_v29  ;;  %v3538_v32 = vld [vmem:[#allocation2 + $0x2c8] ss:$16 sps:$4 sm:$0xff]   ;;  %v3564_v46 = vld [vmem:[#allocation2 + $0x34c] ss:$16 sps:$4 sm:$0xff]   ;;  %s2935_s23 = sshll.u32 %s4003_s22, 4  ;;  %s2936_s23 = int_to_ptr.vmem [resolvable:$true] %s2935_s23 }
  0x47   :  { %v3562_v48 = vld [vmem:[#allocation2 + $0x348] ss:$16 sps:$4 sm:$0xff]   ;;  %s3970_s24 = scalar_lea.vmem %s2936_s23, 128  ;;  %p3975_p3 = scmp.lt.s32.totalorder %s2936_s23, %s2936_s23 }
  0x48   :  { %1303 = vmatpush1.bf16.msra.mxu0 %v3453_v34  ;;  %1467 = vmatpush1.bf16.msra.mxu1 %v3454_v35  ;;  %v3546_v34 = vld [vmem:[#allocation2 + $0x2ec] ss:$16 sps:$4 sm:$0xff]   ;;  %v3541_v35 = vld [vmem:[#allocation2 + $0x2e0] ss:$16 sps:$4 sm:$0xff]   ;;  %p3971_p2 = scmp.ne.s32.totalorder %s2936_s23, %s3970_s24  ;;  %p3976_p4 = scmp.lt.s32.totalorder %s3970_s24, %s3970_s24 }
  0x49   :  { %1304 = vmatprep.subr.bf16.mxu0 %v3455_v36  ;;  %1468 = vmatprep.subr.bf16.mxu1 %v3457_v37  ;;  %v3544_v36 = vld [vmem:[#allocation2 + $0x2e8] ss:$16 sps:$4 sm:$0xff]   ;;  %v3549_v37 = vld [vmem:[#allocation2 + $0x304] ss:$16 sps:$4 sm:$0xff]  }
  0x4a   :  { %p3977_p5 = por %p3976_p4, %p3975_p3 }
  0x4c   :  { %1305 = vmatpush1.bf16.msra.mxu0 %v3459_v38  ;;  %1469 = vmatpush1.bf16.msra.mxu1 %v3460_v39  ;;  %v3552_v38 = vld [vmem:[#allocation2 + $0x30c] ss:$16 sps:$4 sm:$0xff]   ;;  %v3547_v39 = vld [vmem:[#allocation2 + $0x300] ss:$16 sps:$4 sm:$0xff]   ;;  %p3978_p6 = pnand %p3977_p5, %p3971_p2 }
  0x4d   :  { %1306 = vmatprep.subr.bf16.mxu0 %v3461_v40  ;;  %1470 = vmatprep.subr.bf16.mxu1 %v3463_v41  ;;  %v3550_v40 = vld [vmem:[#allocation2 + $0x308] ss:$16 sps:$4 sm:$0xff]   ;;  %v3555_v41 = vld [vmem:[#allocation2 + $0x324] ss:$16 sps:$4 sm:$0xff]  }
  0x50   :  { %1307 = vmatpush1.bf16.msra.mxu0 %v3465_v42  ;;  %1471 = vmatpush1.bf16.msra.mxu1 %v3466_v43  ;;  %v3558_v42 = vld [vmem:[#allocation2 + $0x32c] ss:$16 sps:$4 sm:$0xff]   ;;  %v3553_v43 = vld [vmem:[#allocation2 + $0x320] ss:$16 sps:$4 sm:$0xff]  }
  0x51   :  { %1308 = vmatprep.subr.bf16.mxu0 %v3467_v44  ;;  %1472 = vmatprep.subr.bf16.mxu1 %v3469_v45  ;;  %v3556_v44 = vld [vmem:[#allocation2 + $0x328] ss:$16 sps:$4 sm:$0xff]   ;;  %v3561_v45 = vld [vmem:[#allocation2 + $0x344] ss:$16 sps:$4 sm:$0xff]  }
  0x54   :  { %1309 = vmatpush1.bf16.msra.mxu0 %v3471_v47  ;;  %1473 = vmatpush1.bf16.msra.mxu1 %v3472_v49  ;;  %v3559_v47 = vld [vmem:[#allocation2 + $0x340] ss:$16 sps:$4 sm:$0xff]   ;;  %v3567_v49 = vld [vmem:[#allocation2 + $0x364] ss:$16 sps:$4 sm:$0xff]  }
  0x55   :  { %1310 = vmatprep.subr.bf16.mxu0 %v3473_v50  ;;  %1474 = vmatprep.subr.bf16.mxu1 %v3475_v51  ;;  %v3570_v50 = vld [vmem:[#allocation2 + $0x36c] ss:$16 sps:$4 sm:$0xff]   ;;  %v3565_v51 = vld [vmem:[#allocation2 + $0x360] ss:$16 sps:$4 sm:$0xff]  }
  0x58   :  { %1311 = vmatpush1.bf16.msra.mxu0 %v3477_v52  ;;  %1475 = vmatpush1.bf16.msra.mxu1 %v3478_v53  ;;  %v3568_v52 = vld [vmem:[#allocation2 + $0x368] ss:$16 sps:$4 sm:$0xff]   ;;  %v3573_v53 = vld [vmem:[#allocation2 + $0x384] ss:$16 sps:$4 sm:$0xff]  }
  0x59   :  { %1312 = vmatprep.subr.bf16.mxu0 %v3479_v54  ;;  %1476 = vmatprep.subr.bf16.mxu1 %v3481_v55  ;;  %v3576_v54 = vld [vmem:[#allocation2 + $0x38c] ss:$16 sps:$4 sm:$0xff]   ;;  %v3571_v55 = vld [vmem:[#allocation2 + $0x380] ss:$16 sps:$4 sm:$0xff]  }
  0x5c   :  { %1313 = vmatpush1.bf16.msra.mxu0 %v3483_v56  ;;  %1477 = vmatpush1.bf16.msra.mxu1 %v3484_v57  ;;  %v3574_v56 = vld [vmem:[#allocation2 + $0x388] ss:$16 sps:$4 sm:$0xff]   ;;  %v3579_v57 = vld [vmem:[#allocation2 + $0x3a4] ss:$16 sps:$4 sm:$0xff]  }
  0x5d   :  { %1314 = vmatprep.subr.bf16.mxu0 %v3485_v58  ;;  %1478 = vmatprep.subr.bf16.mxu1 %v3487_v59  ;;  %v3582_v58 = vld [vmem:[#allocation2 + $0x3ac] ss:$16 sps:$4 sm:$0xff]   ;;  %v3577_v59 = vld [vmem:[#allocation2 + $0x3a0] ss:$16 sps:$4 sm:$0xff]  }
  0x60   :  { %1315 = vmatpush1.bf16.msra.mxu0 %v3489_v60  ;;  %1479 = vmatpush1.bf16.msra.mxu1 %v3490_v61  ;;  %v3580_v60 = vld [vmem:[#allocation2 + $0x3a8] ss:$16 sps:$4 sm:$0xff]   ;;  %v3585_v61 = vld [vmem:[#allocation2 + $0x3c4] ss:$16 sps:$4 sm:$0xff]  }
  0x61   :  { %1316 = vmatprep.subr.bf16.mxu0 %v3491_v62  ;;  %1480 = vmatprep.subr.bf16.mxu1 %v3493_v63  ;;  %v3588_v62 = vld [vmem:[#allocation2 + $0x3cc] ss:$16 sps:$4 sm:$0xff]   ;;  %v3583_v63 = vld [vmem:[#allocation2 + $0x3c0] ss:$16 sps:$4 sm:$0xff]  }
  0x64   :  { %1317 = vmatpush1.bf16.msra.mxu0 %v3495_v0  ;;  %1481 = vmatpush1.bf16.msra.mxu1 %v3496_v1  ;;  %v3586_v0 = vld [vmem:[#allocation2 + $0x3c8] ss:$16 sps:$4 sm:$0xff]   ;;  %v3591_v1 = vld [vmem:[#allocation2 + $0x3e4] ss:$16 sps:$4 sm:$0xff]  }
  0x65   :  { %1327 = vmatprep.subr.bf16.mxu0 %v3501_v2  ;;  %1491 = vmatprep.subr.bf16.mxu1 %v3504_v3  ;;  %v3594_v2 = vld [vmem:[#allocation2 + $0x3ec] ss:$16 sps:$4 sm:$0xff]   ;;  %v3589_v3 = vld [vmem:[#allocation2 + $0x3e0] ss:$16 sps:$4 sm:$0xff]  }
  0x67   :  { %1319 = vmatmul.mubr.bf16.vlgmr.msra.gmra.mrb[0].mxu0 %v2945_v4  ;;  %1483 = vmatmul.mubr.bf16.vlgmr.msra.gmra.mrb[0].mxu1 %v2945_v4  ;;  %v3592_v4 = vld [vmem:[#allocation2 + $0x3e8] ss:$16 sps:$4 sm:$0xff]  }
  0x68   :  { %1328 = vmatpush1.bf16.msra.mxu0 %v3499_v5  ;;  %1492 = vmatpush1.bf16.msra.mxu1 %v3502_v6  ;;  %v3599_v5 = vld [vmem:[#allocation2 + $0x404] ss:$16 sps:$4 sm:$0xff]   ;;  %v3602_v6 = vld [vmem:[#allocation2 + $0x40c] ss:$16 sps:$4 sm:$0xff]  }
  0x69   :  { %1329 = vmatprep.subr.bf16.mxu0 %v3507_v7  ;;  %1493 = vmatprep.subr.bf16.mxu1 %v3510_v8  ;;  %v2947_v7 = vcombine.low %v4074_v29, %v4074_v29  ;;  %v3597_v8 = vld [vmem:[#allocation2 + $0x400] ss:$16 sps:$4 sm:$0xff]   ;;  %v3632_v29 = vld [vmem:[#allocation2 + $0x4ac] ss:$16 sps:$4 sm:$0xff]  }
  0x6a   :  { %1359 = vmatprep.mubr.bf16.mxu0 %v2948_v30  ;;  %1523 = vmatprep.mubr.bf16.mxu1 %v2948_v30  ;;  %v3627_v30 = vld [vmem:[#allocation2 + $0x4a0] ss:$16 sps:$4 sm:$0xff]  }
  0x6c   :  { %1330 = vmatpush1.bf16.msra.mxu0 %v3505_v9  ;;  %1494 = vmatpush1.bf16.msra.mxu1 %v3508_v10  ;;  %v3600_v9 = vld [vmem:[#allocation2 + $0x408] ss:$16 sps:$4 sm:$0xff]   ;;  %v3605_v10 = vld [vmem:[#allocation2 + $0x424] ss:$16 sps:$4 sm:$0xff]  }
  0x6d   :  { %1331 = vmatprep.subr.bf16.mxu0 %v3513_v11  ;;  %1495 = vmatprep.subr.bf16.mxu1 %v3516_v12  ;;  %v4083_v11 = vld [vmem:[%s4240_s0 + $0x10] sm:$0xff]  ;;  %v3608_v12 = vld [vmem:[#allocation2 + $0x42c] ss:$16 sps:$4 sm:$0xff]  }
  0x70   :  { %1332 = vmatpush1.bf16.msra.mxu0 %v3511_v13  ;;  %1496 = vmatpush1.bf16.msra.mxu1 %v3514_v14  ;;  %v2950_v13 = vcombine.high %v4083_v11, %v4083_v11  ;;  %v3603_v14 = vld [vmem:[#allocation2 + $0x420] ss:$16 sps:$4 sm:$0xff]  }
  0x71   :  { %1333 = vmatprep.subr.bf16.mxu0 %v3519_v15  ;;  %1497 = vmatprep.subr.bf16.mxu1 %v3522_v16  ;;  %v3606_v15 = vld [vmem:[#allocation2 + $0x428] ss:$16 sps:$4 sm:$0xff]   ;;  %v3611_v16 = vld [vmem:[#allocation2 + $0x444] ss:$16 sps:$4 sm:$0xff]  }
  0x74   :  { %1334 = vmatpush1.bf16.msra.mxu0 %v3517_v17  ;;  %1498 = vmatpush1.bf16.msra.mxu1 %v3520_v18  ;;  %v3614_v17 = vld [vmem:[#allocation2 + $0x44c] ss:$16 sps:$4 sm:$0xff]   ;;  %v3609_v18 = vld [vmem:[#allocation2 + $0x440] ss:$16 sps:$4 sm:$0xff]  }
  0x75   :  { %1335 = vmatprep.subr.bf16.mxu0 %v3525_v19  ;;  %1499 = vmatprep.subr.bf16.mxu1 %v3528_v20  ;;  %v3612_v19 = vld [vmem:[#allocation2 + $0x448] ss:$16 sps:$4 sm:$0xff]   ;;  %v3617_v20 = vld [vmem:[#allocation2 + $0x464] ss:$16 sps:$4 sm:$0xff]  }
  0x78   :  { %1336 = vmatpush1.bf16.msra.mxu0 %v3523_v21  ;;  %1500 = vmatpush1.bf16.msra.mxu1 %v3526_v22  ;;  %v3620_v21 = vld [vmem:[#allocation2 + $0x46c] ss:$16 sps:$4 sm:$0xff]   ;;  %v3615_v22 = vld [vmem:[#allocation2 + $0x460] ss:$16 sps:$4 sm:$0xff]  }
  0x79   :  { %1337 = vmatprep.subr.bf16.mxu0 %v3531_v23  ;;  %1501 = vmatprep.subr.bf16.mxu1 %v3534_v24  ;;  %v3618_v23 = vld [vmem:[#allocation2 + $0x468] ss:$16 sps:$4 sm:$0xff]   ;;  %v3623_v24 = vld [vmem:[#allocation2 + $0x484] ss:$16 sps:$4 sm:$0xff]  }
  0x7c   :  { %1338 = vmatpush1.bf16.msra.mxu0 %v3529_v25  ;;  %1502 = vmatpush1.bf16.msra.mxu1 %v3532_v26  ;;  %v3626_v25 = vld [vmem:[#allocation2 + $0x48c] ss:$16 sps:$4 sm:$0xff]   ;;  %v3621_v26 = vld [vmem:[#allocation2 + $0x480] ss:$16 sps:$4 sm:$0xff]  }
  0x7d   :  { %1339 = vmatprep.subr.bf16.mxu0 %v3537_v27  ;;  %1503 = vmatprep.subr.bf16.mxu1 %v3540_v28  ;;  %v3624_v27 = vld [vmem:[#allocation2 + $0x488] ss:$16 sps:$4 sm:$0xff]   ;;  %v3629_v28 = vld [vmem:[#allocation2 + $0x4a4] ss:$16 sps:$4 sm:$0xff]  }
  0x80   :  { %1340 = vmatpush1.bf16.msra.mxu0 %v3535_v31  ;;  %1504 = vmatpush1.bf16.msra.mxu1 %v3538_v32  ;;  %v3630_v31 = vld [vmem:[#allocation2 + $0x4a8] ss:$16 sps:$4 sm:$0xff]   ;;  %v3635_v32 = vld [vmem:[#allocation2 + $0x4c4] ss:$16 sps:$4 sm:$0xff]  }
  0x81   :  { %1341 = vmatprep.subr.bf16.mxu0 %v3543_v33  ;;  %1505 = vmatprep.subr.bf16.mxu1 %v3546_v34  ;;  %v3638_v33 = vld [vmem:[#allocation2 + $0x4cc] ss:$16 sps:$4 sm:$0xff]   ;;  %v3633_v34 = vld [vmem:[#allocation2 + $0x4c0] ss:$16 sps:$4 sm:$0xff]  }
  0x84   :  { %1342 = vmatpush1.bf16.msra.mxu0 %v3541_v35  ;;  %1506 = vmatpush1.bf16.msra.mxu1 %v3544_v36  ;;  %v3636_v35 = vld [vmem:[#allocation2 + $0x4c8] ss:$16 sps:$4 sm:$0xff]   ;;  %v3641_v36 = vld [vmem:[#allocation2 + $0x4e4] ss:$16 sps:$4 sm:$0xff]  }
  0x85   :  { %1343 = vmatprep.subr.bf16.mxu0 %v3549_v37  ;;  %1507 = vmatprep.subr.bf16.mxu1 %v3552_v38  ;;  %v3644_v37 = vld [vmem:[#allocation2 + $0x4ec] ss:$16 sps:$4 sm:$0xff]   ;;  %v3639_v38 = vld [vmem:[#allocation2 + $0x4e0] ss:$16 sps:$4 sm:$0xff]  }
  0x88   :  { %1344 = vmatpush1.bf16.msra.mxu0 %v3547_v39  ;;  %1508 = vmatpush1.bf16.msra.mxu1 %v3550_v40  ;;  %v3642_v39 = vld [vmem:[#allocation2 + $0x4e8] ss:$16 sps:$4 sm:$0xff]   ;;  %v3647_v40 = vld [vmem:[#allocation2 + $0x504] ss:$16 sps:$4 sm:$0xff]  }
  0x89   :  { %1345 = vmatprep.subr.bf16.mxu0 %v3555_v41  ;;  %1509 = vmatprep.subr.bf16.mxu1 %v3558_v42  ;;  %v3650_v41 = vld [vmem:[#allocation2 + $0x50c] ss:$16 sps:$4 sm:$0xff]   ;;  %v3645_v42 = vld [vmem:[#allocation2 + $0x500] ss:$16 sps:$4 sm:$0xff]  }
  0x8c   :  { %1346 = vmatpush1.bf16.msra.mxu0 %v3553_v43  ;;  %1510 = vmatpush1.bf16.msra.mxu1 %v3556_v44  ;;  %v3648_v43 = vld [vmem:[#allocation2 + $0x508] ss:$16 sps:$4 sm:$0xff]   ;;  %v3653_v44 = vld [vmem:[#allocation2 + $0x524] ss:$16 sps:$4 sm:$0xff]  }
  0x8d   :  { %1347 = vmatprep.subr.bf16.mxu0 %v3561_v45  ;;  %1511 = vmatprep.subr.bf16.mxu1 %v3564_v46  ;;  %v3656_v45 = vld [vmem:[#allocation2 + $0x52c] ss:$16 sps:$4 sm:$0xff]   ;;  %v3651_v46 = vld [vmem:[#allocation2 + $0x520] ss:$16 sps:$4 sm:$0xff]  }
  0x90   :  { %1348 = vmatpush1.bf16.msra.mxu0 %v3559_v47  ;;  %1512 = vmatpush1.bf16.msra.mxu1 %v3562_v48  ;;  %v3654_v47 = vld [vmem:[#allocation2 + $0x528] ss:$16 sps:$4 sm:$0xff]   ;;  %v3659_v48 = vld [vmem:[#allocation2 + $0x544] ss:$16 sps:$4 sm:$0xff]  }
  0x91   :  { %1349 = vmatprep.subr.bf16.mxu0 %v3567_v49  ;;  %1513 = vmatprep.subr.bf16.mxu1 %v3570_v50  ;;  %v3662_v49 = vld [vmem:[#allocation2 + $0x54c] ss:$16 sps:$4 sm:$0xff]   ;;  %v3657_v50 = vld [vmem:[#allocation2 + $0x540] ss:$16 sps:$4 sm:$0xff]  }
  0x94   :  { %1350 = vmatpush1.bf16.msra.mxu0 %v3565_v51  ;;  %1514 = vmatpush1.bf16.msra.mxu1 %v3568_v52  ;;  %v3660_v51 = vld [vmem:[#allocation2 + $0x548] ss:$16 sps:$4 sm:$0xff]   ;;  %v3665_v52 = vld [vmem:[#allocation2 + $0x564] ss:$16 sps:$4 sm:$0xff]  }
  0x95   :  { %1351 = vmatprep.subr.bf16.mxu0 %v3573_v53  ;;  %1515 = vmatprep.subr.bf16.mxu1 %v3576_v54  ;;  %v3668_v53 = vld [vmem:[#allocation2 + $0x56c] ss:$16 sps:$4 sm:$0xff]   ;;  %v3663_v54 = vld [vmem:[#allocation2 + $0x560] ss:$16 sps:$4 sm:$0xff]  }
  0x98   :  { %1352 = vmatpush1.bf16.msra.mxu0 %v3571_v55  ;;  %1516 = vmatpush1.bf16.msra.mxu1 %v3574_v56  ;;  %v3666_v55 = vld [vmem:[#allocation2 + $0x568] ss:$16 sps:$4 sm:$0xff]   ;;  %v3671_v56 = vld [vmem:[#allocation2 + $0x584] ss:$16 sps:$4 sm:$0xff]  }
  0x99   :  { %1353 = vmatprep.subr.bf16.mxu0 %v3579_v57  ;;  %1517 = vmatprep.subr.bf16.mxu1 %v3582_v58  ;;  %v3674_v57 = vld [vmem:[#allocation2 + $0x58c] ss:$16 sps:$4 sm:$0xff]   ;;  %v3669_v58 = vld [vmem:[#allocation2 + $0x580] ss:$16 sps:$4 sm:$0xff]  }
  0x9c   :  { %1354 = vmatpush1.bf16.msra.mxu0 %v3577_v59  ;;  %1518 = vmatpush1.bf16.msra.mxu1 %v3580_v60  ;;  %v3672_v59 = vld [vmem:[#allocation2 + $0x588] ss:$16 sps:$4 sm:$0xff]   ;;  %v3677_v60 = vld [vmem:[#allocation2 + $0x5a4] ss:$16 sps:$4 sm:$0xff]  }
  0x9d   :  { %1355 = vmatprep.subr.bf16.mxu0 %v3585_v61  ;;  %1519 = vmatprep.subr.bf16.mxu1 %v3588_v62  ;;  %v3680_v61 = vld [vmem:[#allocation2 + $0x5ac] ss:$16 sps:$4 sm:$0xff]   ;;  %v3675_v62 = vld [vmem:[#allocation2 + $0x5a0] ss:$16 sps:$4 sm:$0xff]  }
  0xa0   :  { %1356 = vmatpush1.bf16.msra.mxu0 %v3583_v63  ;;  %1520 = vmatpush1.bf16.msra.mxu1 %v3586_v0  ;;  %v3678_v63 = vld [vmem:[#allocation2 + $0x5a8] ss:$16 sps:$4 sm:$0xff]   ;;  %v3683_v0 = vld [vmem:[#allocation2 + $0x5c4] ss:$16 sps:$4 sm:$0xff]  }
  0xa1   :  { %1357 = vmatprep.subr.bf16.mxu0 %v3591_v1  ;;  %1521 = vmatprep.subr.bf16.mxu1 %v3594_v2  ;;  %v3686_v1 = vld [vmem:[#allocation2 + $0x5cc] ss:$16 sps:$4 sm:$0xff]   ;;  %v3681_v2 = vld [vmem:[#allocation2 + $0x5c0] ss:$16 sps:$4 sm:$0xff]  }
  0xa4   :  { %1358 = vmatpush1.bf16.msra.mxu0 %v3589_v3  ;;  %1522 = vmatpush1.bf16.msra.mxu1 %v3592_v4  ;;  %v3684_v3 = vld [vmem:[#allocation2 + $0x5c8] ss:$16 sps:$4 sm:$0xff]   ;;  %v3689_v4 = vld [vmem:[#allocation2 + $0x5e4] ss:$16 sps:$4 sm:$0xff]  }
  0xa5   :  { %1368 = vmatprep.subr.bf16.mxu0 %v3599_v5  ;;  %1532 = vmatprep.subr.bf16.mxu1 %v3602_v6  ;;  %v3692_v5 = vld [vmem:[#allocation2 + $0x5ec] ss:$16 sps:$4 sm:$0xff]   ;;  %v3687_v6 = vld [vmem:[#allocation2 + $0x5e0] ss:$16 sps:$4 sm:$0xff]  }
  0xa7   :  { %1360 = vmatmul.mubr.bf16.vlgmr.msra.gmra.mrb[0].mxu0 %v2947_v7  ;;  %1524 = vmatmul.mubr.bf16.vlgmr.msra.gmra.mrb[0].mxu1 %v2947_v7  ;;  %v3690_v7 = vld [vmem:[#allocation2 + $0x5e8] ss:$16 sps:$4 sm:$0xff]  }
  0xa8   :  { %1369 = vmatpush1.bf16.msra.mxu0 %v3597_v8  ;;  %1533 = vmatpush1.bf16.msra.mxu1 %v3600_v9  ;;  %v3697_v8 = vld [vmem:[#allocation2 + $0x604] ss:$16 sps:$4 sm:$0xff]   ;;  %v3700_v9 = vld [vmem:[#allocation2 + $0x60c] ss:$16 sps:$4 sm:$0xff]  }
  0xa9   :  { %1370 = vmatprep.subr.bf16.mxu0 %v3605_v10  ;;  %1534 = vmatprep.subr.bf16.mxu1 %v3608_v12  ;;  %v3695_v10 = vld [vmem:[#allocation2 + $0x600] ss:$16 sps:$4 sm:$0xff]   ;;  %v3698_v12 = vld [vmem:[#allocation2 + $0x608] ss:$16 sps:$4 sm:$0xff]  }
  0xaa   :  { %1400 = vmatprep.mubr.bf16.mxu0 %v2950_v13  ;;  %1564 = vmatprep.mubr.bf16.mxu1 %v2950_v13  ;;  %v2949_v13 = vcombine.low %v4083_v11, %v4083_v11  ;;  %v3701_v11 = vld [vmem:[%s4240_s0 + $0x18] ss:$0 sps:$4 sm:$0xff]  }
  0xac   :  { %1371 = vmatpush1.bf16.msra.mxu0 %v3603_v14  ;;  %1535 = vmatpush1.bf16.msra.mxu1 %v3606_v15  ;;  %v3704_v14 = vld [vmem:[#allocation5 + $0x4] ss:$16 sps:$4 sm:$0xff]   ;;  %v3707_v15 = vld [vmem:[#allocation5 + $0xc] ss:$16 sps:$4 sm:$0xff]  }
  0xad   :  { %1372 = vmatprep.subr.bf16.mxu0 %v3611_v16  ;;  %1536 = vmatprep.subr.bf16.mxu1 %v3614_v17  ;;  %v4002_v16 = vmov 0   ;;  %v3702_v17 = vld [vmem:[#allocation5] ss:$16 sps:$4 sm:$0xff]  }
  0xb0   :  { %1373 = vmatpush1.bf16.msra.mxu0 %v3609_v18  ;;  %1537 = vmatpush1.bf16.msra.mxu1 %v3612_v19  ;;  %v3705_v18 = vld [vmem:[#allocation5 + $0x8] ss:$16 sps:$4 sm:$0xff]   ;;  %v3710_v19 = vld [vmem:[#allocation5 + $0x24] ss:$16 sps:$4 sm:$0xff]  }
  0xb1   :  { %1374 = vmatprep.subr.bf16.mxu0 %v3617_v20  ;;  %1538 = vmatprep.subr.bf16.mxu1 %v3620_v21  ;;  %v3713_v20 = vld [vmem:[#allocation5 + $0x2c] ss:$16 sps:$4 sm:$0xff]   ;;  %v3708_v21 = vld [vmem:[#allocation5 + $0x20] ss:$16 sps:$4 sm:$0xff]  }
  0xb4   :  { %1375 = vmatpush1.bf16.msra.mxu0 %v3615_v22  ;;  %1539 = vmatpush1.bf16.msra.mxu1 %v3618_v23  ;;  %v3711_v22 = vld [vmem:[#allocation5 + $0x28] ss:$16 sps:$4 sm:$0xff]   ;;  %v3716_v23 = vld [vmem:[#allocation5 + $0x44] ss:$16 sps:$4 sm:$0xff]  }
  0xb5   :  { %1376 = vmatprep.subr.bf16.mxu0 %v3623_v24  ;;  %1540 = vmatprep.subr.bf16.mxu1 %v3626_v25  ;;  %v3719_v24 = vld [vmem:[#allocation5 + $0x4c] ss:$16 sps:$4 sm:$0xff]   ;;  %v3714_v25 = vld [vmem:[#allocation5 + $0x40] ss:$16 sps:$4 sm:$0xff]  }
  0xb8   :  { %1377 = vmatpush1.bf16.msra.mxu0 %v3621_v26  ;;  %1541 = vmatpush1.bf16.msra.mxu1 %v3624_v27  ;;  %v3717_v26 = vld [vmem:[#allocation5 + $0x48] ss:$16 sps:$4 sm:$0xff]   ;;  %v3722_v27 = vld [vmem:[#allocation5 + $0x64] ss:$16 sps:$4 sm:$0xff]  }
  0xb9   :  { %1378 = vmatprep.subr.bf16.mxu0 %v3629_v28  ;;  %1542 = vmatprep.subr.bf16.mxu1 %v3632_v29  ;;  %v3725_v28 = vld [vmem:[#allocation5 + $0x6c] ss:$16 sps:$4 sm:$0xff]   ;;  %v3720_v29 = vld [vmem:[#allocation5 + $0x60] ss:$16 sps:$4 sm:$0xff]  }
  0xbc   :  { %1379 = vmatpush1.bf16.msra.mxu0 %v3627_v30  ;;  %1543 = vmatpush1.bf16.msra.mxu1 %v3630_v31  ;;  %v3723_v30 = vld [vmem:[#allocation5 + $0x68] ss:$16 sps:$4 sm:$0xff]   ;;  %v3728_v31 = vld [vmem:[#allocation5 + $0x84] ss:$16 sps:$4 sm:$0xff]  }
  0xbd   :  { %1380 = vmatprep.subr.bf16.mxu0 %v3635_v32  ;;  %1544 = vmatprep.subr.bf16.mxu1 %v3638_v33  ;;  %v3731_v32 = vld [vmem:[#allocation5 + $0x8c] ss:$16 sps:$4 sm:$0xff]   ;;  %v3726_v33 = vld [vmem:[#allocation5 + $0x80] ss:$16 sps:$4 sm:$0xff]  }
  0xc0   :  { %1381 = vmatpush1.bf16.msra.mxu0 %v3633_v34  ;;  %1545 = vmatpush1.bf16.msra.mxu1 %v3636_v35  ;;  %v3729_v34 = vld [vmem:[#allocation5 + $0x88] ss:$16 sps:$4 sm:$0xff]   ;;  %v3734_v35 = vld [vmem:[#allocation5 + $0xa4] ss:$16 sps:$4 sm:$0xff]  }
  0xc1   :  { %1382 = vmatprep.subr.bf16.mxu0 %v3641_v36  ;;  %1546 = vmatprep.subr.bf16.mxu1 %v3644_v37  ;;  %v3737_v36 = vld [vmem:[#allocation5 + $0xac] ss:$16 sps:$4 sm:$0xff]   ;;  %v3732_v37 = vld [vmem:[#allocation5 + $0xa0] ss:$16 sps:$4 sm:$0xff]  }
  0xc4   :  { %1383 = vmatpush1.bf16.msra.mxu0 %v3639_v38  ;;  %1547 = vmatpush1.bf16.msra.mxu1 %v3642_v39  ;;  %v3735_v38 = vld [vmem:[#allocation5 + $0xa8] ss:$16 sps:$4 sm:$0xff]   ;;  %v3740_v39 = vld [vmem:[#allocation5 + $0xc4] ss:$16 sps:$4 sm:$0xff]  }
  0xc5   :  { %1384 = vmatprep.subr.bf16.mxu0 %v3647_v40  ;;  %1548 = vmatprep.subr.bf16.mxu1 %v3650_v41  ;;  %v3743_v40 = vld [vmem:[#allocation5 + $0xcc] ss:$16 sps:$4 sm:$0xff]   ;;  %v3738_v41 = vld [vmem:[#allocation5 + $0xc0] ss:$16 sps:$4 sm:$0xff]  }
  0xc8   :  { %1385 = vmatpush1.bf16.msra.mxu0 %v3645_v42  ;;  %1549 = vmatpush1.bf16.msra.mxu1 %v3648_v43  ;;  %v3741_v42 = vld [vmem:[#allocation5 + $0xc8] ss:$16 sps:$4 sm:$0xff]   ;;  %v3746_v43 = vld [vmem:[#allocation5 + $0xe4] ss:$16 sps:$4 sm:$0xff]  }
  0xc9   :  { %1386 = vmatprep.subr.bf16.mxu0 %v3653_v44  ;;  %1550 = vmatprep.subr.bf16.mxu1 %v3656_v45  ;;  %v3749_v44 = vld [vmem:[#allocation5 + $0xec] ss:$16 sps:$4 sm:$0xff]   ;;  %v3744_v45 = vld [vmem:[#allocation5 + $0xe0] ss:$16 sps:$4 sm:$0xff]  }
  0xcc   :  { %1387 = vmatpush1.bf16.msra.mxu0 %v3651_v46  ;;  %1551 = vmatpush1.bf16.msra.mxu1 %v3654_v47  ;;  %v3747_v46 = vld [vmem:[#allocation5 + $0xe8] ss:$16 sps:$4 sm:$0xff]   ;;  %v3752_v47 = vld [vmem:[#allocation5 + $0x104] ss:$16 sps:$4 sm:$0xff]  }
  0xcd   :  { %1388 = vmatprep.subr.bf16.mxu0 %v3659_v48  ;;  %1552 = vmatprep.subr.bf16.mxu1 %v3662_v49  ;;  %v3755_v48 = vld [vmem:[#allocation5 + $0x10c] ss:$16 sps:$4 sm:$0xff]   ;;  %v3750_v49 = vld [vmem:[#allocation5 + $0x100] ss:$16 sps:$4 sm:$0xff]  }
  0xd0   :  { %1389 = vmatpush1.bf16.msra.mxu0 %v3657_v50  ;;  %1553 = vmatpush1.bf16.msra.mxu1 %v3660_v51  ;;  %v3753_v50 = vld [vmem:[#allocation5 + $0x108] ss:$16 sps:$4 sm:$0xff]   ;;  %v3758_v51 = vld [vmem:[#allocation5 + $0x124] ss:$16 sps:$4 sm:$0xff]  }
  0xd1   :  { %1390 = vmatprep.subr.bf16.mxu0 %v3665_v52  ;;  %1554 = vmatprep.subr.bf16.mxu1 %v3668_v53  ;;  %v3761_v52 = vld [vmem:[#allocation5 + $0x12c] ss:$16 sps:$4 sm:$0xff]   ;;  %v3756_v53 = vld [vmem:[#allocation5 + $0x120] ss:$16 sps:$4 sm:$0xff]  }
  0xd4   :  { %1391 = vmatpush1.bf16.msra.mxu0 %v3663_v54  ;;  %1555 = vmatpush1.bf16.msra.mxu1 %v3666_v55  ;;  %v3759_v54 = vld [vmem:[#allocation5 + $0x128] ss:$16 sps:$4 sm:$0xff]   ;;  %v3764_v55 = vld [vmem:[#allocation5 + $0x144] ss:$16 sps:$4 sm:$0xff]  }
  0xd5   :  { %1392 = vmatprep.subr.bf16.mxu0 %v3671_v56  ;;  %1556 = vmatprep.subr.bf16.mxu1 %v3674_v57  ;;  %v3767_v56 = vld [vmem:[#allocation5 + $0x14c] ss:$16 sps:$4 sm:$0xff]   ;;  %v3762_v57 = vld [vmem:[#allocation5 + $0x140] ss:$16 sps:$4 sm:$0xff]  }
  0xd8   :  { %1393 = vmatpush1.bf16.msra.mxu0 %v3669_v58  ;;  %1557 = vmatpush1.bf16.msra.mxu1 %v3672_v59  ;;  %v3765_v58 = vld [vmem:[#allocation5 + $0x148] ss:$16 sps:$4 sm:$0xff]   ;;  %v3770_v59 = vld [vmem:[#allocation5 + $0x164] ss:$16 sps:$4 sm:$0xff]  }
  0xd9   :  { %1394 = vmatprep.subr.bf16.mxu0 %v3677_v60  ;;  %1558 = vmatprep.subr.bf16.mxu1 %v3680_v61  ;;  %v3773_v60 = vld [vmem:[#allocation5 + $0x16c] ss:$16 sps:$4 sm:$0xff]   ;;  %v3768_v61 = vld [vmem:[#allocation5 + $0x160] ss:$16 sps:$4 sm:$0xff]  }
  0xdc   :  { %1395 = vmatpush1.bf16.msra.mxu0 %v3675_v62  ;;  %1559 = vmatpush1.bf16.msra.mxu1 %v3678_v63  ;;  %v3771_v62 = vld [vmem:[#allocation5 + $0x168] ss:$16 sps:$4 sm:$0xff]   ;;  %v3776_v63 = vld [vmem:[#allocation5 + $0x184] ss:$16 sps:$4 sm:$0xff]  }
  0xdd   :  { %1396 = vmatprep.subr.bf16.mxu0 %v3683_v0  ;;  %1560 = vmatprep.subr.bf16.mxu1 %v3686_v1  ;;  %v3779_v0 = vld [vmem:[#allocation5 + $0x18c] ss:$16 sps:$4 sm:$0xff]   ;;  %v3774_v1 = vld [vmem:[#allocation5 + $0x180] ss:$16 sps:$4 sm:$0xff]  }
  0xe0   :  { %1397 = vmatpush1.bf16.msra.mxu0 %v3681_v2  ;;  %1561 = vmatpush1.bf16.msra.mxu1 %v3684_v3  ;;  %v3777_v2 = vld [vmem:[#allocation5 + $0x188] ss:$16 sps:$4 sm:$0xff]   ;;  %v3782_v3 = vld [vmem:[#allocation5 + $0x1a4] ss:$16 sps:$4 sm:$0xff]  }
  0xe1   :  { %1398 = vmatprep.subr.bf16.mxu0 %v3689_v4  ;;  %1562 = vmatprep.subr.bf16.mxu1 %v3692_v5  ;;  %v3785_v4 = vld [vmem:[#allocation5 + $0x1ac] ss:$16 sps:$4 sm:$0xff]   ;;  %v3780_v5 = vld [vmem:[#allocation5 + $0x1a0] ss:$16 sps:$4 sm:$0xff]  }
  0xe4   :  { %1399 = vmatpush1.bf16.msra.mxu0 %v3687_v6  ;;  %1563 = vmatpush1.bf16.msra.mxu1 %v3690_v7  ;;  %v3783_v6 = vld [vmem:[#allocation5 + $0x1a8] ss:$16 sps:$4 sm:$0xff]   ;;  %v3788_v7 = vld [vmem:[#allocation5 + $0x1c4] ss:$16 sps:$4 sm:$0xff]  }
  0xe5   :  { %1409 = vmatprep.subr.bf16.mxu0 %v3697_v8  ;;  %1573 = vmatprep.subr.bf16.mxu1 %v3700_v9  ;;  %v3791_v8 = vld [vmem:[#allocation5 + $0x1cc] ss:$16 sps:$4 sm:$0xff]   ;;  %v3786_v9 = vld [vmem:[#allocation5 + $0x1c0] ss:$16 sps:$4 sm:$0xff]  }
  0xe7   :  { %1401 = vmatmul.mubr.bf16.vlgmr.msra.gmra.mrb[0].mxu0 %v2949_v13  ;;  %1565 = vmatmul.mubr.bf16.vlgmr.msra.gmra.mrb[0].mxu1 %v2949_v13  ;;  %v3797_v13 = vld [vmem:[#allocation5 + $0x1ec] ss:$16 sps:$4 sm:$0xff]  }
  0xe8   :  { %1410 = vmatpush1.bf16.msra.mxu0 %v3695_v10  ;;  %1574 = vmatpush1.bf16.msra.mxu1 %v3698_v12  ;;  %v3789_v10 = vld [vmem:[#allocation5 + $0x1c8] ss:$16 sps:$4 sm:$0xff]   ;;  %v3794_v12 = vld [vmem:[#allocation5 + $0x1e4] ss:$16 sps:$4 sm:$0xff]  }
  0xe9   :  { %1441 = vmatprep.mubr.bf16.mxu0 %v4002_v16  ;;  %1605 = vmatprep.mubr.bf16.mxu1 %v4002_v16  ;;  %v3800_v16 = vld [vmem:[#allocation5 + $0x204] ss:$16 sps:$4 sm:$0xff]  }
  0xea   :  { %2412 = vmatprep.subr.bf16.mxu0 %v3704_v14  ;;  %2494 = vmatprep.subr.bf16.mxu1 %v3707_v15  ;;  %v3792_v14 = vld [vmem:[#allocation5 + $0x1e0] ss:$16 sps:$4 sm:$0xff]   ;;  %v3795_v15 = vld [vmem:[#allocation5 + $0x1e8] ss:$16 sps:$4 sm:$0xff]  }
  0xf3   :  { %3148 = vmatmul.mubr.msk.bf16.vlgmr.msra.gmra.mrb[0].mxu0 %vm1282_vm0, %v3701_v11  ;;  %3149 = vmatmul.mubr.msk.bf16.vlgmr.msra.gmra.mrb[0].mxu1 %vm1282_vm0, %v3701_v11  ;;  %v3803_v11 = vld [vmem:[#allocation5 + $0x20c] ss:$16 sps:$4 sm:$0xff]  }
  0xf4   :  { %2413 = vmatpush1.bf16.msra.mxu0 %v3702_v17  ;;  %2495 = vmatpush1.bf16.msra.mxu1 %v3705_v18  ;;  %v258_v17 = vlaneseq }
  0xf5   :  { %2414 = vmatprep.subr.bf16.mxu0 %v3710_v19  ;;  %2496 = vmatprep.subr.bf16.mxu1 %v3713_v20  ;;  %v4098_v20 = vld [vmem:[%s4242_s2] sm:$0xf] }
  0xf6   :  { %v4092_v18 = vshrl.u32 %v258_v17, 7  ;;  %v3860_v17 = vld [vmem:[#allocation5 + $0x344] ss:$16 sps:$4 sm:$0xff]  }
  0xf8   :  { %2415 = vmatpush1.bf16.msra.mxu0 %v3708_v21  ;;  %2497 = vmatpush1.bf16.msra.mxu1 %v3711_v22  ;;  %v260_v19 = vsub.s32 0, %v4092_v18  ;;  %v264_v21 = vsub.s32 1, %v4092_v18  ;;  %v272_v22 = vsub.s32 3, %v4092_v18 }
  0xf9   :  { %2416 = vmatprep.subr.bf16.mxu0 %v3716_v23  ;;  %2498 = vmatprep.subr.bf16.mxu1 %v3719_v24 }
  0xfa   :  { %v261_v23 = vrot.slane %v4098_v20, %v260_v19  ;;  %v265_v24 = vrot.slane %v4098_v20, %v264_v21 }
  0xfc   :  { %2417 = vmatpush1.bf16.msra.mxu0 %v3714_v25  ;;  %2499 = vmatpush1.bf16.msra.mxu1 %v3717_v26  ;;  %v273_v25 = vrot.slane %v4098_v20, %v272_v22 }
  0xfd   :  { %2418 = vmatprep.subr.bf16.mxu0 %v3722_v27  ;;  %2500 = vmatprep.subr.bf16.mxu1 %v3725_v28 }
 0x100   :  { %2419 = vmatpush1.bf16.msra.mxu0 %v3720_v29  ;;  %2501 = vmatpush1.bf16.msra.mxu1 %v3723_v30 }
 0x101   :  { %2420 = vmatprep.subr.bf16.mxu0 %v3728_v31  ;;  %2502 = vmatprep.subr.bf16.mxu1 %v3731_v32 }
 0x104   :  { %2421 = vmatpush1.bf16.msra.mxu0 %v3726_v33  ;;  %2503 = vmatpush1.bf16.msra.mxu1 %v3729_v34 }
 0x105   :  { %2422 = vmatprep.subr.bf16.mxu0 %v3734_v35  ;;  %2504 = vmatprep.subr.bf16.mxu1 %v3737_v36 }
 0x108   :  { %2423 = vmatpush1.bf16.msra.mxu0 %v3732_v37  ;;  %2505 = vmatpush1.bf16.msra.mxu1 %v3735_v38 }
 0x109   :  { %2424 = vmatprep.subr.bf16.mxu0 %v3740_v39  ;;  %2506 = vmatprep.subr.bf16.mxu1 %v3743_v40 }
 0x10c   :  { %2425 = vmatpush1.bf16.msra.mxu0 %v3738_v41  ;;  %2507 = vmatpush1.bf16.msra.mxu1 %v3741_v42  ;;  %v3798_v41 = vld [vmem:[#allocation5 + $0x200] ss:$16 sps:$4 sm:$0xff]   ;;  %v3801_v42 = vld [vmem:[#allocation5 + $0x208] ss:$16 sps:$4 sm:$0xff]  }
 0x10d   :  { %2426 = vmatprep.subr.bf16.mxu0 %v3746_v43  ;;  %2508 = vmatprep.subr.bf16.mxu1 %v3749_v44  ;;  %v3806_v44 = vld [vmem:[#allocation5 + $0x224] ss:$16 sps:$4 sm:$0xff]  }
 0x110   :  { %2427 = vmatpush1.bf16.msra.mxu0 %v3744_v45  ;;  %2509 = vmatpush1.bf16.msra.mxu1 %v3747_v46  ;;  %v3809_v45 = vld [vmem:[#allocation5 + $0x22c] ss:$16 sps:$4 sm:$0xff]  }
 0x111   :  { %2428 = vmatprep.subr.bf16.mxu0 %v3752_v47  ;;  %2510 = vmatprep.subr.bf16.mxu1 %v3755_v48  ;;  %v3804_v47 = vld [vmem:[#allocation5 + $0x220] ss:$16 sps:$4 sm:$0xff]   ;;  %v3807_v48 = vld [vmem:[#allocation5 + $0x228] ss:$16 sps:$4 sm:$0xff]  }
 0x114   :  { %2429 = vmatpush1.bf16.msra.mxu0 %v3750_v49  ;;  %2511 = vmatpush1.bf16.msra.mxu1 %v3753_v50  ;;  %v3812_v49 = vld [vmem:[#allocation5 + $0x244] ss:$16 sps:$4 sm:$0xff]   ;;  %v3815_v50 = vld [vmem:[#allocation5 + $0x24c] ss:$16 sps:$4 sm:$0xff]  }
 0x115   :  { %2430 = vmatprep.subr.bf16.mxu0 %v3758_v51  ;;  %2512 = vmatprep.subr.bf16.mxu1 %v3761_v52  ;;  %v3810_v51 = vld [vmem:[#allocation5 + $0x240] ss:$16 sps:$4 sm:$0xff]   ;;  %v3813_v52 = vld [vmem:[#allocation5 + $0x248] ss:$16 sps:$4 sm:$0xff]  }
 0x118   :  { %2431 = vmatpush1.bf16.msra.mxu0 %v3756_v53  ;;  %2513 = vmatpush1.bf16.msra.mxu1 %v3759_v54  ;;  %v3818_v53 = vld [vmem:[#allocation5 + $0x264] ss:$16 sps:$4 sm:$0xff]   ;;  %v3821_v54 = vld [vmem:[#allocation5 + $0x26c] ss:$16 sps:$4 sm:$0xff]  }
 0x119   :  { %2432 = vmatprep.subr.bf16.mxu0 %v3764_v55  ;;  %2514 = vmatprep.subr.bf16.mxu1 %v3767_v56  ;;  %v3816_v55 = vld [vmem:[#allocation5 + $0x260] ss:$16 sps:$4 sm:$0xff]   ;;  %v3819_v56 = vld [vmem:[#allocation5 + $0x268] ss:$16 sps:$4 sm:$0xff]  }
 0x11c   :  { %2433 = vmatpush1.bf16.msra.mxu0 %v3762_v57  ;;  %2515 = vmatpush1.bf16.msra.mxu1 %v3765_v58  ;;  %v3824_v57 = vld [vmem:[#allocation5 + $0x284] ss:$16 sps:$4 sm:$0xff]   ;;  %v3827_v58 = vld [vmem:[#allocation5 + $0x28c] ss:$16 sps:$4 sm:$0xff]  }
 0x11d   :  { %2434 = vmatprep.subr.bf16.mxu0 %v3770_v59  ;;  %2516 = vmatprep.subr.bf16.mxu1 %v3773_v60  ;;  %v3822_v59 = vld [vmem:[#allocation5 + $0x280] ss:$16 sps:$4 sm:$0xff]   ;;  %v3825_v60 = vld [vmem:[#allocation5 + $0x288] ss:$16 sps:$4 sm:$0xff]  }
 0x120   :  { %2435 = vmatpush1.bf16.msra.mxu0 %v3768_v61  ;;  %2517 = vmatpush1.bf16.msra.mxu1 %v3771_v62  ;;  %v3830_v61 = vld [vmem:[#allocation5 + $0x2a4] ss:$16 sps:$4 sm:$0xff]   ;;  %v3833_v62 = vld [vmem:[#allocation5 + $0x2ac] ss:$16 sps:$4 sm:$0xff]  }
 0x121   :  { %2436 = vmatprep.subr.bf16.mxu0 %v3776_v63  ;;  %2518 = vmatprep.subr.bf16.mxu1 %v3779_v0  ;;  %v3828_v63 = vld [vmem:[#allocation5 + $0x2a0] ss:$16 sps:$4 sm:$0xff]   ;;  %v3831_v0 = vld [vmem:[#allocation5 + $0x2a8] ss:$16 sps:$4 sm:$0xff]  }
 0x124   :  { %2437 = vmatpush1.bf16.msra.mxu0 %v3774_v1  ;;  %2519 = vmatpush1.bf16.msra.mxu1 %v3777_v2  ;;  %v3836_v1 = vld [vmem:[#allocation5 + $0x2c4] ss:$16 sps:$4 sm:$0xff]   ;;  %v3839_v2 = vld [vmem:[#allocation5 + $0x2cc] ss:$16 sps:$4 sm:$0xff]  }
 0x125   :  { %2438 = vmatprep.subr.bf16.mxu0 %v3782_v3  ;;  %2520 = vmatprep.subr.bf16.mxu1 %v3785_v4  ;;  %v3834_v3 = vld [vmem:[#allocation5 + $0x2c0] ss:$16 sps:$4 sm:$0xff]   ;;  %v3837_v4 = vld [vmem:[#allocation5 + $0x2c8] ss:$16 sps:$4 sm:$0xff]  }
 0x128   :  { %2439 = vmatpush1.bf16.msra.mxu0 %v3780_v5  ;;  %2521 = vmatpush1.bf16.msra.mxu1 %v3783_v6  ;;  %v3842_v5 = vld [vmem:[#allocation5 + $0x2e4] ss:$16 sps:$4 sm:$0xff]   ;;  %v3845_v6 = vld [vmem:[#allocation5 + $0x2ec] ss:$16 sps:$4 sm:$0xff]  }
 0x129   :  { %2440 = vmatprep.subr.bf16.mxu0 %v3788_v7  ;;  %2522 = vmatprep.subr.bf16.mxu1 %v3791_v8  ;;  %v3840_v7 = vld [vmem:[#allocation5 + $0x2e0] ss:$16 sps:$4 sm:$0xff]   ;;  %v3843_v8 = vld [vmem:[#allocation5 + $0x2e8] ss:$16 sps:$4 sm:$0xff]  }
 0x12c   :  { %2441 = vmatpush1.bf16.msra.mxu0 %v3786_v9  ;;  %2523 = vmatpush1.bf16.msra.mxu1 %v3789_v10  ;;  %v3848_v9 = vld [vmem:[#allocation5 + $0x304] ss:$16 sps:$4 sm:$0xff]   ;;  %v3851_v10 = vld [vmem:[#allocation5 + $0x30c] ss:$16 sps:$4 sm:$0xff]  }
 0x12d   :  { %2442 = vmatprep.subr.bf16.mxu0 %v3794_v12  ;;  %2524 = vmatprep.subr.bf16.mxu1 %v3797_v13  ;;  %v3846_v12 = vld [vmem:[#allocation5 + $0x300] ss:$16 sps:$4 sm:$0xff]   ;;  %v3849_v13 = vld [vmem:[#allocation5 + $0x308] ss:$16 sps:$4 sm:$0xff]  }
 0x130   :  { %2443 = vmatpush1.bf16.msra.mxu0 %v3792_v14  ;;  %2525 = vmatpush1.bf16.msra.mxu1 %v3795_v15  ;;  %v3854_v14 = vld [vmem:[#allocation5 + $0x324] ss:$16 sps:$4 sm:$0xff]   ;;  %v3857_v15 = vld [vmem:[#allocation5 + $0x32c] ss:$16 sps:$4 sm:$0xff]  }
 0x131   :  { %2453 = vmatprep.subr.bf16.mxu0 %v3800_v16  ;;  %2535 = vmatprep.subr.bf16.mxu1 %v3803_v11  ;;  %v3852_v16 = vld [vmem:[#allocation5 + $0x320] ss:$16 sps:$4 sm:$0xff]   ;;  %v3855_v11 = vld [vmem:[#allocation5 + $0x328] ss:$16 sps:$4 sm:$0xff]  }
 0x1c6   :  { %v1443_v26 = vpop.f32.mrb[0].mxu0  ;;  %v4111_v27 = vpop.f32.mrb[0].mxu1 }
 0x1c7   :  { %v3355_v28 = vadd.f32 %v1443_v26, %v261_v23  ;;  %v1445_v29 = vpop.f32.mrb[1].mxu0  ;;  %v1609_v30 = vpop.f32.mrb[1].mxu1  ;;  %v3863_v23 = vld [vmem:[#allocation5 + $0x34c] ss:$16 sps:$4 sm:$0xff]   ;;  %v3866_v26 = vld [vmem:[#allocation5 + $0x364] ss:$16 sps:$4 sm:$0xff]  }
 0x1c8   :  { %v3356_v31 = vadd.f32 %v1445_v29, %v265_v24  ;;  %v3358_v32 = vadd.f32 %v1609_v30, %v273_v25  ;;  %v1447_v33 = vpop.f32.mrb[2].mxu0  ;;  %v1611_v34 = vpop.f32.mrb[2].mxu1  ;;  %v3858_v24 = vld [vmem:[#allocation5 + $0x340] ss:$16 sps:$4 sm:$0xff]   ;;  %v3861_v25 = vld [vmem:[#allocation5 + $0x348] ss:$16 sps:$4 sm:$0xff]  }
 0x1c9   :  { %v1614_v35 = vmax.f32 %v3355_v28, 0.0  ;;  %v1448_v36 = vpop.f32.mrb[3].mxu0  ;;  %v1612_v37 = vpop.f32.mrb[3].mxu1  ;;  %v3869_v28 = vld [vmem:[#allocation5 + $0x36c] ss:$16 sps:$4 sm:$0xff]  }
 0x1ca   :  { %v1615_v38 = vmax.f32 %v3356_v31, 0.0  ;;  %v1617_v39 = vmax.f32 %v3358_v32, 0.0  ;;  %v3864_v29 = vld [vmem:[#allocation5 + $0x360] ss:$16 sps:$4 sm:$0xff]   ;;  %v3867_v30 = vld [vmem:[#allocation5 + $0x368] ss:$16 sps:$4 sm:$0xff]  }
 0x1cb   :  { %v1618_v43 = vpack.c.bf16 %v1614_v35, %v1614_v35  ;;  %v3872_v31 = vld [vmem:[#allocation5 + $0x384] ss:$16 sps:$4 sm:$0xff]   ;;  %v3875_v32 = vld [vmem:[#allocation5 + $0x38c] ss:$16 sps:$4 sm:$0xff]   ;;  %v3870_v33 = vld [vmem:[#allocation5 + $0x380] ss:$16 sps:$4 sm:$0xff]  }
 0x1cc   :  { %v1619_v40 = vpack.c.bf16 %v1615_v38, %v1615_v38  ;;  %v1621_v46 = vpack.c.bf16 %v1617_v39, %v1617_v39  ;;  %v3873_v34 = vld [vmem:[#allocation5 + $0x388] ss:$16 sps:$4 sm:$0xff]   ;;  %v268_v35 = vsub.s32 2, %v4092_v18  ;;  %v3878_v36 = vld [vmem:[#allocation5 + $0x3a4] ss:$16 sps:$4 sm:$0xff]  }
 0x1cd   :  { %v3881_v37 = vld [vmem:[#allocation5 + $0x3ac] ss:$16 sps:$4 sm:$0xff]   ;;  %v3876_v38 = vld [vmem:[#allocation5 + $0x3a0] ss:$16 sps:$4 sm:$0xff]   ;;  %v3879_v39 = vld [vmem:[#allocation5 + $0x3a8] ss:$16 sps:$4 sm:$0xff]  }
 0x1ce   :  { %2444 = vmatprep.mubr.bf16.mxu0 %v1619_v40  ;;  %2526 = vmatprep.mubr.bf16.mxu1 %v1619_v40  ;;  %v269_v40 = vrot.slane %v4098_v20, %v268_v35  ;;  %v3894_v20 = vld [vmem:[%s4245_s5 + $0x40] sm:$0xff]  }
 0x1cf   :  { %2445 = vmatmul.mubr.bf16.vlgmr.msra.gmra.mrb[4].mxu0 %v1618_v43  ;;  %2527 = vmatmul.mubr.bf16.vlgmr.msra.gmra.mrb[4].mxu1 %v1618_v43  ;;  %v3882_v43 = vld [vmem:[#allocation5 + $0x3c0] ss:$16 sps:$4 sm:$0xff]  }
 0x1d0   :  { %2454 = vmatpush1.bf16.msra.mxu0 %v3798_v41  ;;  %2536 = vmatpush1.bf16.msra.mxu1 %v3801_v42  ;;  %v3884_v41 = vld [vmem:[#allocation5 + $0x3c4] ss:$16 sps:$4 sm:$0xff]   ;;  %v3887_v42 = vld [vmem:[#allocation5 + $0x3cc] ss:$16 sps:$4 sm:$0xff]  }
 0x1d1   :  { %2485 = vmatprep.mubr.bf16.mxu0 %v1621_v46  ;;  %2567 = vmatprep.mubr.bf16.mxu1 %v1621_v46  ;;  %v3890_v46 = vld [vmem:[#allocation5 + $0x3e4] ss:$16 sps:$4 sm:$0xff]  }
 0x1d2   :  { %2455 = vmatprep.subr.bf16.mxu0 %v3806_v44  ;;  %2537 = vmatprep.subr.bf16.mxu1 %v3809_v45  ;;  %v3885_v44 = vld [vmem:[#allocation5 + $0x3c8] ss:$16 sps:$4 sm:$0xff]   ;;  %v3357_v45 = vadd.f32 %v4111_v27, %v269_v40  ;;  %v3896_v27 = vld [vmem:[%s4245_s5] sm:$0xff]  }
 0x1d4   :  { %2456 = vmatpush1.bf16.msra.mxu0 %v3804_v47  ;;  %2538 = vmatpush1.bf16.msra.mxu1 %v3807_v48  ;;  %v3893_v47 = vld [vmem:[#allocation5 + $0x3ec] ss:$16 sps:$4 sm:$0xff]   ;;  %v3888_v48 = vld [vmem:[#allocation5 + $0x3e0] ss:$16 sps:$4 sm:$0xff]  }
 0x1d5   :  { %2457 = vmatprep.subr.bf16.mxu0 %v3812_v49  ;;  %2539 = vmatprep.subr.bf16.mxu1 %v3815_v50  ;;  %v3891_v49 = vld [vmem:[#allocation5 + $0x3e8] ss:$16 sps:$4 sm:$0xff]   ;;  %v1616_v50 = vmax.f32 %v3357_v45, 0.0 }
 0x1d8   :  { %2458 = vmatpush1.bf16.msra.mxu0 %v3810_v51  ;;  %2540 = vmatpush1.bf16.msra.mxu1 %v3813_v52  ;;  %v3895_v51 = vld [vmem:[%s4245_s5 + $0xc0] sm:$0xff]  }
 0x1d9   :  { %2459 = vmatprep.subr.bf16.mxu0 %v3818_v53  ;;  %2541 = vmatprep.subr.bf16.mxu1 %v3821_v54  ;;  %v3897_v52 = vld [vmem:[%s4245_s5 + $0x80] sm:$0xff]   ;;  %v1620_v53 = vpack.c.bf16 %v1616_v50, %v1616_v50  ;;  %v3898_v54 = vld [vmem:[%s4245_s5 + $0x48] sm:$0xff]  }
 0x1dc   :  { %2460 = vmatpush1.bf16.msra.mxu0 %v3816_v55  ;;  %2542 = vmatpush1.bf16.msra.mxu1 %v3819_v56  ;;  %v3899_v55 = vld [vmem:[%s4245_s5 + $0xc8] sm:$0xff]  }
 0x1dd   :  { %2461 = vmatprep.subr.bf16.mxu0 %v3824_v57  ;;  %2543 = vmatprep.subr.bf16.mxu1 %v3827_v58  ;;  %v3900_v56 = vld [vmem:[%s4245_s5 + $0x8] sm:$0xff]   ;;  %v3902_v58 = vld [vmem:[%s4245_s5 + $0x50] sm:$0xff]  }
 0x1de   :  { %v3901_v57 = vld [vmem:[%s4245_s5 + $0x88] sm:$0xff]  }
 0x1e0   :  { %2462 = vmatpush1.bf16.msra.mxu0 %v3822_v59  ;;  %2544 = vmatpush1.bf16.msra.mxu1 %v3825_v60  ;;  %v3903_v59 = vld [vmem:[%s4245_s5 + $0xd0] sm:$0xff]  }
 0x1e1   :  { %2463 = vmatprep.subr.bf16.mxu0 %v3830_v61  ;;  %2545 = vmatprep.subr.bf16.mxu1 %v3833_v62  ;;  %v3904_v60 = vld [vmem:[%s4245_s5 + $0x10] sm:$0xff]   ;;  %v3906_v62 = vld [vmem:[%s4245_s5 + $0x58] sm:$0xff]  }
 0x1e2   :  { %v3905_v61 = vld [vmem:[%s4245_s5 + $0x90] sm:$0xff]  }
 0x1e4   :  { %2464 = vmatpush1.bf16.msra.mxu0 %v3828_v63  ;;  %2546 = vmatpush1.bf16.msra.mxu1 %v3831_v0  ;;  %v3907_v63 = vld [vmem:[%s4245_s5 + $0xd8] sm:$0xff]  }
 0x1e5   :  { %2465 = vmatprep.subr.bf16.mxu0 %v3836_v1  ;;  %2547 = vmatprep.subr.bf16.mxu1 %v3839_v2  ;;  %v3908_v0 = vld [vmem:[%s4245_s5 + $0x18] sm:$0xff]   ;;  %v3910_v2 = vld [vmem:[%s4245_s5 + $0x60] sm:$0xff]  }
 0x1e6   :  { %v3909_v1 = vld [vmem:[%s4245_s5 + $0x98] sm:$0xff]  }
 0x1e8   :  { %2466 = vmatpush1.bf16.msra.mxu0 %v3834_v3  ;;  %2548 = vmatpush1.bf16.msra.mxu1 %v3837_v4  ;;  %v3911_v3 = vld [vmem:[%s4245_s5 + $0xe0] sm:$0xff]  }
 0x1e9   :  { %2467 = vmatprep.subr.bf16.mxu0 %v3842_v5  ;;  %2549 = vmatprep.subr.bf16.mxu1 %v3845_v6  ;;  %v3912_v4 = vld [vmem:[%s4245_s5 + $0x20] sm:$0xff]   ;;  %v3914_v6 = vld [vmem:[%s4245_s5 + $0x68] sm:$0xff]  }
 0x1ea   :  { %v3913_v5 = vld [vmem:[%s4245_s5 + $0xa0] sm:$0xff]  }
 0x1ec   :  { %2468 = vmatpush1.bf16.msra.mxu0 %v3840_v7  ;;  %2550 = vmatpush1.bf16.msra.mxu1 %v3843_v8  ;;  %v3915_v7 = vld [vmem:[%s4245_s5 + $0xe8] sm:$0xff]  }
 0x1ed   :  { %2469 = vmatprep.subr.bf16.mxu0 %v3848_v9  ;;  %2551 = vmatprep.subr.bf16.mxu1 %v3851_v10  ;;  %v3916_v8 = vld [vmem:[%s4245_s5 + $0x28] sm:$0xff]   ;;  %v3918_v10 = vld [vmem:[%s4245_s5 + $0x70] sm:$0xff]  }
 0x1ee   :  { %v3917_v9 = vld [vmem:[%s4245_s5 + $0xa8] sm:$0xff]  }
 0x1f0   :  { %2470 = vmatpush1.bf16.msra.mxu0 %v3846_v12  ;;  %2552 = vmatpush1.bf16.msra.mxu1 %v3849_v13  ;;  %v3919_v12 = vld [vmem:[%s4245_s5 + $0xf0] sm:$0xff]  }
 0x1f1   :  { %2471 = vmatprep.subr.bf16.mxu0 %v3854_v14  ;;  %2553 = vmatprep.subr.bf16.mxu1 %v3857_v15  ;;  %v3920_v13 = vld [vmem:[%s4245_s5 + $0x30] sm:$0xff]   ;;  %v3922_v15 = vld [vmem:[%s4245_s5 + $0x78] sm:$0xff]  }
 0x1f2   :  { %v3921_v14 = vld [vmem:[%s4245_s5 + $0xb0] sm:$0xff]  }
 0x1f4   :  { %2472 = vmatpush1.bf16.msra.mxu0 %v3852_v16  ;;  %2554 = vmatpush1.bf16.msra.mxu1 %v3855_v11  ;;  %v3923_v16 = vld [vmem:[%s4245_s5 + $0xf8] sm:$0xff]  }
 0x1f5   :  { %2473 = vmatprep.subr.bf16.mxu0 %v3860_v17  ;;  %2555 = vmatprep.subr.bf16.mxu1 %v3863_v23  ;;  %v3924_v11 = vld [vmem:[%s4245_s5 + $0x38] sm:$0xff]   ;;  %v1750_v23 = vld [vmem:[%s4244_s4] sm:$0xf] }
 0x1f6   :  { %v3925_v17 = vld [vmem:[%s4245_s5 + $0xb8] sm:$0xff]  }
 0x1f8   :  { %2474 = vmatpush1.bf16.msra.mxu0 %v3858_v24  ;;  %2556 = vmatpush1.bf16.msra.mxu1 %v3861_v25  ;;  %v1755_v24 = vrot.slane %v1750_v23, %v260_v19  ;;  %v1763_v25 = vrot.slane %v1750_v23, %v268_v35 }
 0x1f9   :  { %2475 = vmatprep.subr.bf16.mxu0 %v3866_v26  ;;  %2557 = vmatprep.subr.bf16.mxu1 %v3869_v28  ;;  %v1759_v26 = vrot.slane %v1750_v23, %v264_v21  ;;  %v1767_v28 = vrot.slane %v1750_v23, %v272_v22 }
 0x1fc   :  { %2476 = vmatpush1.bf16.msra.mxu0 %v3864_v29  ;;  %2558 = vmatpush1.bf16.msra.mxu1 %v3867_v30 }
 0x1fd   :  { %2477 = vmatprep.subr.bf16.mxu0 %v3872_v31  ;;  %2559 = vmatprep.subr.bf16.mxu1 %v3875_v32 }
 0x200   :  { %2478 = vmatpush1.bf16.msra.mxu0 %v3870_v33  ;;  %2560 = vmatpush1.bf16.msra.mxu1 %v3873_v34 }
 0x201   :  { %2479 = vmatprep.subr.bf16.mxu0 %v3878_v36  ;;  %2561 = vmatprep.subr.bf16.mxu1 %v3881_v37 }
 0x204   :  { %2480 = vmatpush1.bf16.msra.mxu0 %v3876_v38  ;;  %2562 = vmatpush1.bf16.msra.mxu1 %v3879_v39 }
 0x205   :  { %2481 = vmatprep.subr.bf16.mxu0 %v3884_v41  ;;  %2563 = vmatprep.subr.bf16.mxu1 %v3887_v42 }
 0x208   :  { %2482 = vmatpush1.bf16.msra.mxu0 %v3882_v43  ;;  %2564 = vmatpush1.bf16.msra.mxu1 %v3885_v44 }
 0x209   :  { %2483 = vmatprep.subr.bf16.mxu0 %v3890_v46  ;;  %2565 = vmatprep.subr.bf16.mxu1 %v3893_v47  ;;  %v3278_v47 = vld [vmem:[%s4246_s6] ss:$0 sm:$0xff] }
 0x20c   :  { %2484 = vmatpush1.bf16.msra.mxu0 %v3888_v48  ;;  %2566 = vmatpush1.bf16.msra.mxu1 %v3891_v49 }
 0x20d   :  { %3311 = vmatprep.subr.bf16.mxu0 %v3894_v20  ;;  %3333 = vmatprep.subr.bf16.mxu1 %v3895_v51 }
 0x20f   :  { %2486 = vmatmul.mubr.bf16.vlgmr.msra.gmra.mrb[4].mxu0 %v1620_v53  ;;  %2568 = vmatmul.mubr.bf16.vlgmr.msra.gmra.mrb[4].mxu1 %v1620_v53 }
 0x210   :  { %3312 = vmatpush3.bf16.msra.mxu0 %v3896_v27  ;;  %3334 = vmatpush3.bf16.msra.mxu1 %v3897_v52 }
 0x211   :  { %3313 = vmatprep.subr.bf16.mxu0 %v3898_v54  ;;  %3335 = vmatprep.subr.bf16.mxu1 %v3899_v55 }
 0x214   :  { %3314 = vmatpush3.bf16.msra.mxu0 %v3900_v56  ;;  %3336 = vmatpush3.bf16.msra.mxu1 %v3901_v57 }
 0x215   :  { %3315 = vmatprep.subr.bf16.mxu0 %v3902_v58  ;;  %3337 = vmatprep.subr.bf16.mxu1 %v3903_v59 }
 0x218   :  { %3316 = vmatpush3.bf16.msra.mxu0 %v3904_v60  ;;  %3338 = vmatpush3.bf16.msra.mxu1 %v3905_v61 }
 0x219   :  { %3317 = vmatprep.subr.bf16.mxu0 %v3906_v62  ;;  %3339 = vmatprep.subr.bf16.mxu1 %v3907_v63 }
 0x21c   :  { %3318 = vmatpush3.bf16.msra.mxu0 %v3908_v0  ;;  %3340 = vmatpush3.bf16.msra.mxu1 %v3909_v1 }
 0x21d   :  { %3319 = vmatprep.subr.bf16.mxu0 %v3910_v2  ;;  %3341 = vmatprep.subr.bf16.mxu1 %v3911_v3 }
 0x220   :  { %3320 = vmatpush3.bf16.msra.mxu0 %v3912_v4  ;;  %3342 = vmatpush3.bf16.msra.mxu1 %v3913_v5 }
 0x221   :  { %3321 = vmatprep.subr.bf16.mxu0 %v3914_v6  ;;  %3343 = vmatprep.subr.bf16.mxu1 %v3915_v7 }
 0x224   :  { %3322 = vmatpush3.bf16.msra.mxu0 %v3916_v8  ;;  %3344 = vmatpush3.bf16.msra.mxu1 %v3917_v9 }
 0x225   :  { %3323 = vmatprep.subr.bf16.mxu0 %v3918_v10  ;;  %3345 = vmatprep.subr.bf16.mxu1 %v3919_v12 }
 0x228   :  { %3324 = vmatpush3.bf16.msra.mxu0 %v3920_v13  ;;  %3346 = vmatpush3.bf16.msra.mxu1 %v3921_v14 }
 0x229   :  { %3325 = vmatprep.subr.bf16.mxu0 %v3922_v15  ;;  %3347 = vmatprep.subr.bf16.mxu1 %v3923_v16 }
 0x22c   :  { %3326 = vmatpush3.bf16.msra.mxu0 %v3924_v11  ;;  %3348 = vmatpush3.bf16.msra.mxu1 %v3925_v17 }
 0x2e2   :  { %v2487_v29 = vpop.f32.mrb[4].mxu0  ;;  %v2569_v30 = vpop.f32.mrb[4].mxu1 }
 0x2e3   :  { %v3359_v31 = vadd.f32 %v2487_v29, %v1755_v24  ;;  %v3361_v32 = vadd.f32 %v2569_v30, %v1763_v25  ;;  %v2489_v33 = vpop.f32.mrb[5].mxu0  ;;  %v2571_v34 = vpop.f32.mrb[5].mxu1 }
 0x2e4   :  { %v3360_v36 = vadd.f32 %v2489_v33, %v1759_v26  ;;  %v3362_v37 = vadd.f32 %v2571_v34, %v1767_v28  ;;  %v2491_v38 = vpop.f32.mrb[6].mxu0  ;;  %v2573_v39 = vpop.f32.mrb[6].mxu1 }
 0x2e5   :  { %v2576_v19 = vmax.f32 %v3359_v31, 0.0  ;;  %v2578_v40 = vmax.f32 %v3361_v32, 0.0  ;;  %v2492_v41 = vpop.f32.mrb[7].mxu0  ;;  %v2574_v35 = vpop.f32.mrb[7].mxu1 }
 0x2e6   :  { %v2577_v42 = vmax.f32 %v3360_v36, 0.0  ;;  %v2579_v43 = vmax.f32 %v3362_v37, 0.0 }
 0x2e7   :  { %v2580_v18 = vpack.c.bf16 %v2576_v19, %v2576_v19  ;;  %v2582_v22 = vpack.c.bf16 %v2578_v40, %v2578_v40 }
 0x2e8   :  { %v2581_v21 = vpack.c.bf16 %v2577_v42, %v2577_v42  ;;  %v2583_v44 = vpack.c.bf16 %v2579_v43, %v2579_v43 }
 0x2ea   :  { %2879 = vmatprep.mubr.bf16.mxu0 %v2581_v21  ;;  %2919 = vmatprep.mubr.bf16.mxu1 %v2583_v44 }
 0x2eb   :  { %2880 = vmatmul.mubr.bf16.vlgmr.msra.gmra.mrb[8].mxu0 %v2580_v18  ;;  %2920 = vmatmul.mubr.bf16.vlgmr.msra.gmra.mrb[8].mxu1 %v2582_v22 }
 0x3be   :  { %v3327_v45 = vpop.f32.mrb[8].mxu0  ;;  %v3349_v46 = vpop.f32.mrb[8].mxu1 }
 0x3bf   :  { %v3328_v48 = vpop.f32.mrb[9].mxu0  ;;  %v3350_v49 = vpop.f32.mrb[9].mxu1 }
 0x3c0   :  { %v3329_v50 = vadd.f32 %v3328_v48, %v3327_v45  ;;  %v3351_v20 = vadd.f32 %v3350_v49, %v3349_v46  ;;  %v3330_v51 = vpop.f32.mrb[10].mxu0  ;;  %v3352_v27 = vpop.f32.mrb[10].mxu1 }
 0x3c1   :  { %v3331_v52 = vpop.f32.mrb[11].mxu0  ;;  %v3353_v53 = vpop.f32.mrb[11].mxu1 }
 0x3c2   :  { %v2882_v54 = vadd.f32 %v3329_v50, %v3278_v47 }
 0x3c4   :  { %v2922_v55 = vadd.f32 %v3351_v20, %v2882_v54 }
 0x3c6   :  { %2928 = vst.msk [vmem:[#allocation7] sm:$0xff] %vm2927_vm1, %v2922_v55 }
 0x3c7   :  { %3981 = shalt.err (!%p3978_p6)
}
 0x3c8   :  { %s3982_s25 = scalar_lea.hbm %s4247_s7, 128 }
 0x3c9   :  { %p3983_p7 = scmp.ne.s32.totalorder %s4247_s7, %s3982_s25  ;;  %p3986_p8 = scmp.lt.u32.totalorder %s3982_s25, %s4247_s7 }
 0x3cb   :  { %p3988_p9 = pnand %p3986_p8, %p3983_p7 }
 0x3cd   :  { %3991 = shalt.err (!%p3988_p9)
}
 0x3ce   :  { %2938 = dma.vmem_to_hbm [thread:$0]  %s2936_s23, 128, %s4247_s7, [#allocation4]  }
 0x3cf   :  { %3996 = dma.done.wait [#allocation4], 128  }
 0x3d0   :  { %3997 = vsyncadd [#allocation4], 4294967168 }
 0x3d1   :  { %2942 = vsyncpa [#allocation3], 1 }
 0x3d2   :  { %2943 = vsyncpa [#allocation6], 1 }
 0x3d3   :  { %2944 = vsyncpa [#allocation4], 1 }

</bundles_post_ra>
